<compile_context>
chip_gen: v7x
topology: tpu7x:2x2x1
jax: 0.10.0
libtpu: 0.0.40
codegen_flags: <defaults>
</compile_context>

<pallas_src>
import functools
import math

import jax
import jax.numpy as jnp
from jax.experimental import pallas as pl
from jax.experimental.pallas import tpu as pltpu


def _encoder_kernel(
    x_ref,                      # (Bt, S, H)   encoder input tile
    ln1_g_ref, ln1_b_ref,       # (1, H)
    wqkv_ref, bqkv_ref,         # (H, 3H), (1, 3H)
    wo_ref, bo_ref,             # (num_heads, head_dim, H), (1, H)
    ln2_g_ref, ln2_b_ref,       # (1, H)
    w1_ref, b1_ref,             # (H, I), (1, I)
    w2_ref, b2_ref,             # (I, H), (1, H)
    out_ref,                    # (Bt, S, H)
    state_ref,                  # (Bt, S, H) f32 scratch: residual stream, resident across layers
    *,
    num_heads: int,
    head_dim: int,
    ln_eps: float,
):
    layer = pl.program_id(1)
    Bt, S, H = x_ref.shape
    M = Bt * S
    mxu_dtype = wqkv_ref.dtype            # MXU operands in the params' dtype (bf16-friendly)
    scale = 1.0 / math.sqrt(head_dim)

    # First layer of this batch tile: load the input into the resident state.
    @pl.when(layer == 0)
    def _():
        state_ref[...] = x_ref[...].astype(jnp.float32)

    # Residual stream flattened to (M, H); elementwise math in f32.
    x = state_ref[...].reshape(M, H)

    def layer_norm(v, g_ref, b_ref):
        mean = jnp.mean(v, axis=-1, keepdims=True)
        var = jnp.mean(jnp.square(v - mean), axis=-1, keepdims=True)
        return (v - mean) * jax.lax.rsqrt(var + ln_eps) * g_ref[0] + b_ref[0]

    # ---------------- attention block ----------------
    h_ln = layer_norm(x, ln1_g_ref, ln1_b_ref)

    # Fused QKV projection: a single (M, H) x (H, 3H) MXU matmul.
    qkv = jnp.dot(h_ln.astype(mxu_dtype), wqkv_ref[...],
                  preferred_element_type=jnp.float32) + bqkv_ref[0].astype(jnp.float32)

    # Per-head attention, batched over the Bt batch elements in this tile.
    # K-transpose is folded into the contraction; the per-head context is folded
    # through its (head_dim, H) slice of the output projection and accumulated,
    # so no lane-axis concatenate and only one (M, H) accumulator stays live.
    attn = jnp.zeros((M, H), jnp.float32)
    for h in range(num_heads):
        q_h = (qkv[:, h * head_dim:(h + 1) * head_dim] * scale).reshape(Bt, S, head_dim)
        k_h = qkv[:, H + h * head_dim:H + (h + 1) * head_dim].reshape(Bt, S, head_dim)
        v_h = qkv[:, 2 * H + h * head_dim:2 * H + (h + 1) * head_dim].reshape(Bt, S, head_dim)

        s = jnp.einsum("bqd,bkd->bqk", q_h.astype(mxu_dtype), k_h.astype(mxu_dtype),
                       preferred_element_type=jnp.float32)
        s = s - jnp.max(s, axis=-1, keepdims=True)
        e = jnp.exp(s)
        p = e * pl.reciprocal(jnp.sum(e, axis=-1, keepdims=True), approx=True)
        ctx = jnp.einsum("bqk,bkd->bqd", p.astype(mxu_dtype), v_h.astype(mxu_dtype),
                         preferred_element_type=jnp.float32)          # (Bt, S, head_dim)
        attn = attn + jnp.dot(ctx.reshape(M, head_dim).astype(mxu_dtype), wo_ref[h],
                              preferred_element_type=jnp.float32)
    h1 = attn + bo_ref[0].astype(jnp.float32) + x                      # proj bias + residual

    # ---------------- MLP block ----------------
    h_ln2 = layer_norm(h1, ln2_g_ref, ln2_b_ref)
    m = jnp.dot(h_ln2.astype(mxu_dtype), w1_ref[...],
                preferred_element_type=jnp.float32) + b1_ref[0].astype(jnp.float32)
    # TODO(synk): config.hidden_act == "gelu" is exact erf-GELU in transformers;
    # tanh-approximate GELU is used here (and in the in-script reference) since
    # erf has no guaranteed Mosaic lowering.
    m = jax.nn.gelu(m, approximate=True)
    m = jnp.dot(m.astype(mxu_dtype), w2_ref[...],
                preferred_element_type=jnp.float32) + b2_ref[0].astype(jnp.float32)
    out = (m + h1).reshape(Bt, S, H)

    # Keep the residual stream resident for the next layer.
    state_ref[...] = out

    # Only the last layer's result ever leaves VMEM.
    @pl.when(layer == pl.num_programs(1) - 1)
    def _():
        out_ref[...] = out.astype(out_ref.dtype)


def _pick_batch_tile(batch, seq, target_rows=256):
    """Largest batch tile whose row count fits the MXU target; prefer >=2 grid
    steps (v7x has 2 TensorCores) when that still keeps M >= 128."""
    divisors = [d for d in range(1, batch + 1) if batch % d == 0]
    fit = [d for d in divisors if d * seq <= max(target_rows, seq)]
    best = max(fit)
    two_step = [d for d in fit if (batch // d) >= 2 and d * seq >= min(128, best * seq)]
    if two_step:
        best = max(two_step)
    return best


def blip2_encoder(x, layer_params, *, num_heads, ln_eps=1e-6):
    """Blip2Encoder.forward (no mask, return only last_hidden_state).

    x: [B, S, H]; layer_params: list of per-layer dicts (see init_layer below).
    """
    B, S, H = x.shape
    L = len(layer_params)
    assert H % num_heads == 0
    head_dim = H // num_heads
    inter = layer_params[0]["w_fc1"].shape[1]

    Bt = _pick_batch_tile(B, S)
    assert B % Bt == 0
    grid = (B // Bt, L)   # batch tiles (parallel) x layers (arbitrary, innermost)

    def stack(name):
        return jnp.stack([p[name] for p in layer_params])

    ln1_g, ln1_b = stack("ln1_g"), stack("ln1_b")          # (L, 1, H)
    w_qkv, b_qkv = stack("w_qkv"), stack("b_qkv")          # (L, H, 3H), (L, 1, 3H)
    # Output projection pre-split per head: (H, H) -> (num_heads, head_dim, H)
    # so the kernel indexes a leading dim instead of slicing lanes.
    wo = jnp.stack([p["w_proj"].reshape(num_heads, head_dim, H) for p in layer_params])
    b_proj = stack("b_proj")                               # (L, 1, H)
    ln2_g, ln2_b = stack("ln2_g"), stack("ln2_b")          # (L, 1, H)
    w_fc1, b_fc1 = stack("w_fc1"), stack("b_fc1")          # (L, H, I), (L, 1, I)
    w_fc2, b_fc2 = stack("w_fc2"), stack("b_fc2")          # (L, I, H), (L, 1, H)

    kernel = functools.partial(
        _encoder_kernel, num_heads=num_heads, head_dim=head_dim, ln_eps=ln_eps)

    def layer_spec(shape):
        # Per-layer parameter: leading layer dim selected by the layer grid axis
        # and squeezed out of the kernel ref.
        return pl.BlockSpec((None,) + shape, lambda b, l: (l,) + (0,) * len(shape))

    x_spec = pl.BlockSpec((Bt, S, H), lambda b, l: (b, 0, 0))
    in_specs = [
        x_spec,
        layer_spec((1, H)), layer_spec((1, H)),                    # LN1 gamma / beta
        layer_spec((H, 3 * H)), layer_spec((1, 3 * H)),            # fused QKV
        layer_spec((num_heads, head_dim, H)), layer_spec((1, H)),  # out projection
        layer_spec((1, H)), layer_spec((1, H)),                    # LN2 gamma / beta
        layer_spec((H, inter)), layer_spec((1, inter)),            # fc1
        layer_spec((inter, H)), layer_spec((1, H)),                # fc2
    ]

    itemsize = x.dtype.itemsize
    p_itemsize = w_qkv.dtype.itemsize
    # Per-layer parameter footprint.
    wbytes = (H * 3 * H + 3 * H + H * H + H + 4 * H
              + H * inter + inter + inter * H + H) * p_itemsize
    # Weights + x/out tiles are double-buffered; state + intermediates in f32.
    vmem_est = (2 * wbytes
                + 4 * Bt * S * H * itemsize
                + Bt * S * H * 4
                + 4 * Bt * S * (3 * H + inter + 4 * H))
    vmem_limit = int(min(max(vmem_est + (4 << 20), 32 << 20), 100 << 20))

    flops = L * (2 * B * S * (3 * H * H + H * H + 2 * H * inter) + 4 * B * S * S * H)
    transcendentals = L * (B * num_heads * S * S + B * S * inter)
    bytes_accessed = 2 * B * S * H * itemsize + L * wbytes

    return pl.pallas_call(
        kernel,
        out_shape=jax.ShapeDtypeStruct((B, S, H), x.dtype),
        grid=grid,
        in_specs=in_specs,
        out_specs=pl.BlockSpec((Bt, S, H), lambda b, l: (b, 0, 0)),
        scratch_shapes=[pltpu.VMEM((Bt, S, H), jnp.float32)],
        compiler_params=pltpu.CompilerParams(
            dimension_semantics=("parallel", "arbitrary"),
            vmem_limit_bytes=vmem_limit,
        ),
        cost_estimate=pl.CostEstimate(
            flops=int(flops),
            transcendentals=int(transcendentals),
            bytes_accessed=int(bytes_accessed),
        ),
    )(
        x,
        ln1_g, ln1_b,
        w_qkv, b_qkv,
        wo, b_proj,
        ln2_g, ln2_b,
        w_fc1, b_fc1,
        w_fc2, b_fc2,
    )


def _reference_encoder(x, layer_params, *, num_heads, ln_eps=1e-6):
    """Pure-JAX mirror of the PyTorch Blip2Encoder forward (eval mode, no masks)."""
    B, S, H = x.shape
    head_dim = H // num_heads

    def layer_norm(v, g, b):
        mean = jnp.mean(v, axis=-1, keepdims=True)
        var = jnp.mean(jnp.square(v - mean), axis=-1, keepdims=True)
        return (v - mean) / jnp.sqrt(var + ln_eps) * g[0] + b[0]

    h = x
    for p in layer_params:
        residual = h
        y = layer_norm(h, p["ln1_g"], p["ln1_b"])
        qkv = y @ p["w_qkv"] + p["b_qkv"][0]
        qkv = qkv.reshape(B, S, 3, num_heads, head_dim).transpose(2, 0, 3, 1, 4)
        q, k, v = qkv[0], qkv[1], qkv[2]
        s = jnp.einsum("bhqd,bhkd->bhqk", q, k) * (head_dim ** -0.5)
        probs = jax.nn.softmax(s, axis=-1)
        ctx = jnp.einsum("bhqk,bhkd->bhqd", probs, v).transpose(0, 2, 1, 3).reshape(B, S, H)
        h = ctx @ p["w_proj"] + p["b_proj"][0] + residual

        residual = h
        y = layer_norm(h, p["ln2_g"], p["ln2_b"])
        y = jax.nn.gelu(y @ p["w_fc1"] + p["b_fc1"][0], approximate=True)
        h = y @ p["w_fc2"] + p["b_fc2"][0] + residual
    return h


if __name__ == "__main__":
    # Small config consistent with the module: hidden=32, heads=4, intermediate=128,
    # seq=8, batch=2, num_hidden_layers=2.
    B, S, H = 2, 8, 32
    num_heads, inter, num_layers = 4, 128, 2
    ln_eps = 1e-6

    key = jax.random.PRNGKey(0)
    layer_keys = jax.random.split(key, num_layers + 1)

    def init_layer(k):
        ks = jax.random.split(k, 12)

        def lin(kw, kb, fi, fo):
            w = 0.02 * jax.random.normal(kw, (fi, fo), jnp.float32)
            b = 0.01 * jax.random.normal(kb, (1, fo), jnp.float32)
            return w, b

        w_qkv = 0.02 * jax.random.normal(ks[0], (H, 3 * H), jnp.float32)
        q_bias = 0.01 * jax.random.normal(ks[1], (1, H), jnp.float32)
        v_bias = 0.01 * jax.random.normal(ks[2], (1, H), jnp.float32)
        # As in Blip2Attention: qkv bias = [q_bias, zeros (k), v_bias].
        b_qkv = jnp.concatenate([q_bias, jnp.zeros((1, H), jnp.float32), v_bias], axis=-1)
        w_proj, b_proj = lin(ks[3], ks[4], H, H)
        w_fc1, b_fc1 = lin(ks[5], ks[6], H, inter)
        w_fc2, b_fc2 = lin(ks[7], ks[8], inter, H)
        return dict(
            ln1_g=1.0 + 0.1 * jax.random.normal(ks[9], (1, H), jnp.float32),
            ln1_b=0.05 * jax.random.normal(ks[10], (1, H), jnp.float32),
            w_qkv=w_qkv, b_qkv=b_qkv,
            w_proj=w_proj, b_proj=b_proj,
            ln2_g=1.0 + 0.1 * jax.random.normal(ks[11], (1, H), jnp.float32),
            ln2_b=jnp.zeros((1, H), jnp.float32),
            w_fc1=w_fc1, b_fc1=b_fc1, w_fc2=w_fc2, b_fc2=b_fc2,
        )

    layers = [init_layer(layer_keys[i]) for i in range(num_layers)]
    x = jax.random.normal(layer_keys[-1], (B, S, H), jnp.float32)

    encoder = jax.jit(functools.partial(blip2_encoder, num_heads=num_heads, ln_eps=ln_eps))
    out = jax.block_until_ready(encoder(x, layers))

    ref = _reference_encoder(x, layers, num_heads=num_heads, ln_eps=ln_eps)
    assert out.shape == (B, S, H)
    max_err = float(jnp.max(jnp.abs(out - ref)))
    # Tolerance loosened vs exact f32 because the softmax denominator uses the
    # EUP approximate reciprocal (pl.reciprocal(..., approx=True)).
    assert jnp.allclose(out, ref, atol=2e-3, rtol=2e-3), (
        f"mismatch vs pure-JAX reference (max abs err {max_err:.3e})")

    print("KERNEL_OK")
</pallas_src>

<mosaic_0001>
module attributes {stable_mosaic.version = 11 : i64} {
  func.func @_encoder_kernel(%arg0: i32, %arg1: i32, %arg2: memref<2x8x32xf32, #tpu.memory_space<vmem>>, %arg3: memref<1x1x32xf32, #tpu.memory_space<vmem>>, %arg4: memref<1x1x32xf32, #tpu.memory_space<vmem>>, %arg5: memref<1x32x96xf32, #tpu.memory_space<vmem>>, %arg6: memref<1x1x96xf32, #tpu.memory_space<vmem>>, %arg7: memref<1x4x8x32xf32, #tpu.memory_space<vmem>>, %arg8: memref<1x1x32xf32, #tpu.memory_space<vmem>>, %arg9: memref<1x1x32xf32, #tpu.memory_space<vmem>>, %arg10: memref<1x1x32xf32, #tpu.memory_space<vmem>>, %arg11: memref<1x32x128xf32, #tpu.memory_space<vmem>>, %arg12: memref<1x1x128xf32, #tpu.memory_space<vmem>>, %arg13: memref<1x128x32xf32, #tpu.memory_space<vmem>>, %arg14: memref<1x1x32xf32, #tpu.memory_space<vmem>>, %arg15: memref<2x8x32xf32, #tpu.memory_space<vmem>>, %arg16: memref<2x8x32xf32, #tpu.memory_space<vmem>>) attributes {dimension_semantics = [#tpu.dimension_semantics<parallel>, #tpu.dimension_semantics<arbitrary>], iteration_bounds = array<i64: 1, 2>, scalar_prefetch = 0 : i64, scratch_operands = 1 : i64, tpu.core_type = #tpu.core_type<tc>, window_params = [{transform_indices = @transform_0, window_bounds = array<i64: 2, 8, 32>}, {transform_indices = @transform_1, window_bounds = array<i64: 1, 1, 32>}, {transform_indices = @transform_2, window_bounds = array<i64: 1, 1, 32>}, {transform_indices = @transform_3, window_bounds = array<i64: 1, 32, 96>}, {transform_indices = @transform_4, window_bounds = array<i64: 1, 1, 96>}, {transform_indices = @transform_5, window_bounds = array<i64: 1, 4, 8, 32>}, {transform_indices = @transform_6, window_bounds = array<i64: 1, 1, 32>}, {transform_indices = @transform_7, window_bounds = array<i64: 1, 1, 32>}, {transform_indices = @transform_8, window_bounds = array<i64: 1, 1, 32>}, {transform_indices = @transform_9, window_bounds = array<i64: 1, 32, 128>}, {transform_indices = @transform_10, window_bounds = array<i64: 1, 1, 128>}, {transform_indices = @transform_11, window_bounds = array<i64: 1, 128, 32>}, {transform_indices = @transform_12, window_bounds = array<i64: 1, 1, 32>}, {transform_indices = @transform_13, window_bounds = array<i64: 2, 8, 32>}]} {
    %c0_i32 = arith.constant 0 : i32
    %0 = arith.cmpi eq, %arg1, %c0_i32 : i32
    %1 = arith.extui %0 : i1 to i32
    %c0_i32_0 = arith.constant 0 : i32
    %2 = arith.cmpi ne, %1, %c0_i32_0 : i32
    scf.if %2 {
      %c0_94 = arith.constant 0 : index
      %c0_95 = arith.constant 0 : index
      %c0_96 = arith.constant 0 : index
      %211 = vector.load %arg2[%c0_94, %c0_95, %c0_96] : memref<2x8x32xf32, #tpu.memory_space<vmem>>, vector<2x8x32xf32>
      %c0_97 = arith.constant 0 : index
      %c0_98 = arith.constant 0 : index
      %c0_99 = arith.constant 0 : index
      %212 = vector.load %arg16[%c0_97, %c0_98, %c0_99] : memref<2x8x32xf32, #tpu.memory_space<vmem>>, vector<2x8x32xf32>
      tpu.vector_store %arg16[%c0_97, %c0_98, %c0_99], %211 {strides = array<i32>} : memref<2x8x32xf32, #tpu.memory_space<vmem>>, vector<2x8x32xf32>,
    } else {
    }
    %c0 = arith.constant 0 : index
    %c0_1 = arith.constant 0 : index
    %c0_2 = arith.constant 0 : index
    %3 = vector.load %arg16[%c0, %c0_1, %c0_2] : memref<2x8x32xf32, #tpu.memory_space<vmem>>, vector<2x8x32xf32>
    %4 = vector.shape_cast %3 : vector<2x8x32xf32> to vector<16x32xf32>
    %cst = arith.constant dense<0.000000e+00> : vector<16xf32>
    %5 = vector.multi_reduction <add>, %4, %cst [1] : vector<16x32xf32> to vector<16xf32>
    %6 = vector.shape_cast %5 : vector<16xf32> to vector<16x1xf32>
    %cst_3 = arith.constant 3.200000e+01 : f32
    %7 = vector.broadcast %cst_3 : f32 to vector<16x1xf32>
    %8 = arith.divf %6, %7 : vector<16x1xf32>
    %9 = vector.broadcast %8 : vector<16x1xf32> to vector<16x32xf32>
    %10 = arith.subf %4, %9 : vector<16x32xf32>
    %11 = arith.mulf %10, %10 : vector<16x32xf32>
    %cst_4 = arith.constant dense<0.000000e+00> : vector<16xf32>
    %12 = vector.multi_reduction <add>, %11, %cst_4 [1] : vector<16x32xf32> to vector<16xf32>
    %13 = vector.shape_cast %12 : vector<16xf32> to vector<16x1xf32>
    %cst_5 = arith.constant 3.200000e+01 : f32
    %14 = vector.broadcast %cst_5 : f32 to vector<16x1xf32>
    %15 = arith.divf %13, %14 : vector<16x1xf32>
    %16 = vector.broadcast %8 : vector<16x1xf32> to vector<16x32xf32>
    %17 = arith.subf %4, %16 : vector<16x32xf32>
    %cst_6 = arith.constant 9.99999997E-7 : f32
    %18 = vector.broadcast %cst_6 : f32 to vector<16x1xf32>
    %19 = arith.addf %15, %18 : vector<16x1xf32>
    %20 = math.rsqrt %19 : vector<16x1xf32>
    %21 = vector.broadcast %20 : vector<16x1xf32> to vector<16x32xf32>
    %22 = arith.mulf %17, %21 : vector<16x32xf32>
    %c0_7 = arith.constant 0 : index
    %c0_8 = arith.constant 0 : index
    %c0_9 = arith.constant 0 : index
    %23 = vector.load %arg3[%c0_7, %c0_8, %c0_9] : memref<1x1x32xf32, #tpu.memory_space<vmem>>, vector<1x1x32xf32>
    %24 = vector.shape_cast %23 : vector<1x1x32xf32> to vector<32xf32>
    %25 = vector.shape_cast %24 : vector<32xf32> to vector<1x32xf32>
    %26 = vector.broadcast %25 : vector<1x32xf32> to vector<16x32xf32>
    %27 = arith.mulf %22, %26 : vector<16x32xf32>
    %c0_10 = arith.constant 0 : index
    %c0_11 = arith.constant 0 : index
    %c0_12 = arith.constant 0 : index
    %28 = vector.load %arg4[%c0_10, %c0_11, %c0_12] : memref<1x1x32xf32, #tpu.memory_space<vmem>>, vector<1x1x32xf32>
    %29 = vector.shape_cast %28 : vector<1x1x32xf32> to vector<32xf32>
    %30 = vector.shape_cast %29 : vector<32xf32> to vector<1x32xf32>
    %31 = vector.broadcast %30 : vector<1x32xf32> to vector<16x32xf32>
    %32 = arith.addf %27, %31 : vector<16x32xf32>
    %c0_13 = arith.constant 0 : index
    %c0_14 = arith.constant 0 : index
    %c0_15 = arith.constant 0 : index
    %33 = vector.load %arg5[%c0_13, %c0_14, %c0_15] : memref<1x32x96xf32, #tpu.memory_space<vmem>>, vector<1x32x96xf32>
    %34 = vector.shape_cast %33 : vector<1x32x96xf32> to vector<32x96xf32>
    %cst_16 = arith.constant dense<0.000000e+00> : vector<16x96xf32>
    %35 = tpu.matmul %32, %34, %cst_16 {dimension_numbers = #tpu.dot_dimension_numbers<[1], [0], [0], [1], [0, 0, 1, 1], [], []>} : vector<16x32xf32>, vector<32x96xf32>, vector<16x96xf32> -> vector<16x96xf32>
    %c0_17 = arith.constant 0 : index
    %c0_18 = arith.constant 0 : index
    %c0_19 = arith.constant 0 : index
    %36 = vector.load %arg6[%c0_17, %c0_18, %c0_19] : memref<1x1x96xf32, #tpu.memory_space<vmem>>, vector<1x1x96xf32>
    %37 = vector.shape_cast %36 : vector<1x1x96xf32> to vector<96xf32>
    %38 = vector.shape_cast %37 : vector<96xf32> to vector<1x96xf32>
    %39 = vector.broadcast %38 : vector<1x96xf32> to vector<16x96xf32>
    %40 = arith.addf %35, %39 : vector<16x96xf32>
    %cst_20 = arith.constant 0.000000e+00 : f32
    %41 = vector.broadcast %cst_20 : f32 to vector<16x32xf32>
    %42 = vector.extract_strided_slice %40 {offsets = [0, 0], sizes = [16, 8], strides = [1, 1]} : vector<16x96xf32> to vector<16x8xf32>
    %cst_21 = arith.constant 0.353553385 : f32
    %43 = vector.broadcast %cst_21 : f32 to vector<16x8xf32>
    %44 = arith.mulf %42, %43 : vector<16x8xf32>
    %45 = vector.shape_cast %44 : vector<16x8xf32> to vector<2x8x8xf32>
    %46 = vector.extract_strided_slice %40 {offsets = [0, 32], sizes = [16, 8], strides = [1, 1]} : vector<16x96xf32> to vector<16x8xf32>
    %47 = vector.shape_cast %46 : vector<16x8xf32> to vector<2x8x8xf32>
    %48 = vector.extract_strided_slice %40 {offsets = [0, 64], sizes = [16, 8], strides = [1, 1]} : vector<16x96xf32> to vector<16x8xf32>
    %49 = vector.shape_cast %48 : vector<16x8xf32> to vector<2x8x8xf32>
    "tpu.trace_start"() <{level = 10 : i32, message = "bqd,bkd->bqk"}> : () -> ()
    %cst_22 = arith.constant dense<0.000000e+00> : vector<2x8x8xf32>
    %50 = tpu.matmul %45, %47, %cst_22 {dimension_numbers = #tpu.dot_dimension_numbers<[2], [2], [1], [1], [0, 0, 0, 1, 1, 1], [0], [0]>} : vector<2x8x8xf32>, vector<2x8x8xf32>, vector<2x8x8xf32> -> vector<2x8x8xf32>
    "tpu.trace_stop"() : () -> ()
    %cst_23 = arith.constant dense<0xFF800000> : vector<2x8xf32>
    %51 = vector.multi_reduction <maximumf>, %50, %cst_23 [2] : vector<2x8x8xf32> to vector<2x8xf32>
    %52 = vector.shape_cast %51 : vector<2x8xf32> to vector<2x8x1xf32>
    %53 = vector.broadcast %52 : vector<2x8x1xf32> to vector<2x8x8xf32>
    %54 = arith.subf %50, %53 : vector<2x8x8xf32>
    %55 = math.exp %54 : vector<2x8x8xf32>
    %cst_24 = arith.constant dense<0.000000e+00> : vector<2x8xf32>
    %56 = vector.multi_reduction <add>, %55, %cst_24 [2] : vector<2x8x8xf32> to vector<2x8xf32>
    %57 = vector.shape_cast %56 : vector<2x8xf32> to vector<2x8x1xf32>
    %58 = tpu.reciprocal %57 {approx = true} : vector<2x8x1xf32> -> vector<2x8x1xf32>
    %59 = vector.broadcast %58 : vector<2x8x1xf32> to vector<2x8x8xf32>
    %60 = arith.mulf %55, %59 : vector<2x8x8xf32>
    "tpu.trace_start"() <{level = 10 : i32, message = "bqk,bkd->bqd"}> : () -> ()
    %cst_25 = arith.constant dense<0.000000e+00> : vector<2x8x8xf32>
    %61 = tpu.matmul %60, %49, %cst_25 {dimension_numbers = #tpu.dot_dimension_numbers<[2], [1], [1], [2], [0, 0, 0, 1, 1, 2], [0], [0]>} : vector<2x8x8xf32>, vector<2x8x8xf32>, vector<2x8x8xf32> -> vector<2x8x8xf32>
    "tpu.trace_stop"() : () -> ()
    %62 = vector.shape_cast %61 : vector<2x8x8xf32> to vector<16x8xf32>
    %c0_26 = arith.constant 0 : index
    %c0_27 = arith.constant 0 : index
    %c0_28 = arith.constant 0 : index
    %c0_29 = arith.constant 0 : index
    %63 = vector.load %arg7[%c0_26, %c0_27, %c0_28, %c0_29] : memref<1x4x8x32xf32, #tpu.memory_space<vmem>>, vector<1x1x8x32xf32>
    %64 = vector.shape_cast %63 : vector<1x1x8x32xf32> to vector<8x32xf32>
    %cst_30 = arith.constant dense<0.000000e+00> : vector<16x32xf32>
    %65 = tpu.matmul %62, %64, %cst_30 {dimension_numbers = #tpu.dot_dimension_numbers<[1], [0], [0], [1], [0, 0, 1, 1], [], []>} : vector<16x8xf32>, vector<8x32xf32>, vector<16x32xf32> -> vector<16x32xf32>
    %66 = arith.addf %41, %65 : vector<16x32xf32>
    %67 = vector.extract_strided_slice %40 {offsets = [0, 8], sizes = [16, 8], strides = [1, 1]} : vector<16x96xf32> to vector<16x8xf32>
    %cst_31 = arith.constant 0.353553385 : f32
    %68 = vector.broadcast %cst_31 : f32 to vector<16x8xf32>
    %69 = arith.mulf %67, %68 : vector<16x8xf32>
    %70 = vector.shape_cast %69 : vector<16x8xf32> to vector<2x8x8xf32>
    %71 = vector.extract_strided_slice %40 {offsets = [0, 40], sizes = [16, 8], strides = [1, 1]} : vector<16x96xf32> to vector<16x8xf32>
    %72 = vector.shape_cast %71 : vector<16x8xf32> to vector<2x8x8xf32>
    %73 = vector.extract_strided_slice %40 {offsets = [0, 72], sizes = [16, 8], strides = [1, 1]} : vector<16x96xf32> to vector<16x8xf32>
    %74 = vector.shape_cast %73 : vector<16x8xf32> to vector<2x8x8xf32>
    "tpu.trace_start"() <{level = 10 : i32, message = "bqd,bkd->bqk"}> : () -> ()
    %cst_32 = arith.constant dense<0.000000e+00> : vector<2x8x8xf32>
    %75 = tpu.matmul %70, %72, %cst_32 {dimension_numbers = #tpu.dot_dimension_numbers<[2], [2], [1], [1], [0, 0, 0, 1, 1, 1], [0], [0]>} : vector<2x8x8xf32>, vector<2x8x8xf32>, vector<2x8x8xf32> -> vector<2x8x8xf32>
    "tpu.trace_stop"() : () -> ()
    %cst_33 = arith.constant dense<0xFF800000> : vector<2x8xf32>
    %76 = vector.multi_reduction <maximumf>, %75, %cst_33 [2] : vector<2x8x8xf32> to vector<2x8xf32>
    %77 = vector.shape_cast %76 : vector<2x8xf32> to vector<2x8x1xf32>
    %78 = vector.broadcast %77 : vector<2x8x1xf32> to vector<2x8x8xf32>
    %79 = arith.subf %75, %78 : vector<2x8x8xf32>
    %80 = math.exp %79 : vector<2x8x8xf32>
    %cst_34 = arith.constant dense<0.000000e+00> : vector<2x8xf32>
    %81 = vector.multi_reduction <add>, %80, %cst_34 [2] : vector<2x8x8xf32> to vector<2x8xf32>
    %82 = vector.shape_cast %81 : vector<2x8xf32> to vector<2x8x1xf32>
    %83 = tpu.reciprocal %82 {approx = true} : vector<2x8x1xf32> -> vector<2x8x1xf32>
    %84 = vector.broadcast %83 : vector<2x8x1xf32> to vector<2x8x8xf32>
    %85 = arith.mulf %80, %84 : vector<2x8x8xf32>
    "tpu.trace_start"() <{level = 10 : i32, message = "bqk,bkd->bqd"}> : () -> ()
    %cst_35 = arith.constant dense<0.000000e+00> : vector<2x8x8xf32>
    %86 = tpu.matmul %85, %74, %cst_35 {dimension_numbers = #tpu.dot_dimension_numbers<[2], [1], [1], [2], [0, 0, 0, 1, 1, 2], [0], [0]>} : vector<2x8x8xf32>, vector<2x8x8xf32>, vector<2x8x8xf32> -> vector<2x8x8xf32>
    "tpu.trace_stop"() : () -> ()
    %87 = vector.shape_cast %86 : vector<2x8x8xf32> to vector<16x8xf32>
    %c0_36 = arith.constant 0 : index
    %c1 = arith.constant 1 : index
    %c0_37 = arith.constant 0 : index
    %c0_38 = arith.constant 0 : index
    %88 = vector.load %arg7[%c0_36, %c1, %c0_37, %c0_38] : memref<1x4x8x32xf32, #tpu.memory_space<vmem>>, vector<1x1x8x32xf32>
    %89 = vector.shape_cast %88 : vector<1x1x8x32xf32> to vector<8x32xf32>
    %cst_39 = arith.constant dense<0.000000e+00> : vector<16x32xf32>
    %90 = tpu.matmul %87, %89, %cst_39 {dimension_numbers = #tpu.dot_dimension_numbers<[1], [0], [0], [1], [0, 0, 1, 1], [], []>} : vector<16x8xf32>, vector<8x32xf32>, vector<16x32xf32> -> vector<16x32xf32>
    %91 = arith.addf %66, %90 : vector<16x32xf32>
    %92 = vector.extract_strided_slice %40 {offsets = [0, 16], sizes = [16, 8], strides = [1, 1]} : vector<16x96xf32> to vector<16x8xf32>
    %cst_40 = arith.constant 0.353553385 : f32
    %93 = vector.broadcast %cst_40 : f32 to vector<16x8xf32>
    %94 = arith.mulf %92, %93 : vector<16x8xf32>
    %95 = vector.shape_cast %94 : vector<16x8xf32> to vector<2x8x8xf32>
    %96 = vector.extract_strided_slice %40 {offsets = [0, 48], sizes = [16, 8], strides = [1, 1]} : vector<16x96xf32> to vector<16x8xf32>
    %97 = vector.shape_cast %96 : vector<16x8xf32> to vector<2x8x8xf32>
    %98 = vector.extract_strided_slice %40 {offsets = [0, 80], sizes = [16, 8], strides = [1, 1]} : vector<16x96xf32> to vector<16x8xf32>
    %99 = vector.shape_cast %98 : vector<16x8xf32> to vector<2x8x8xf32>
    "tpu.trace_start"() <{level = 10 : i32, message = "bqd,bkd->bqk"}> : () -> ()
    %cst_41 = arith.constant dense<0.000000e+00> : vector<2x8x8xf32>
    %100 = tpu.matmul %95, %97, %cst_41 {dimension_numbers = #tpu.dot_dimension_numbers<[2], [2], [1], [1], [0, 0, 0, 1, 1, 1], [0], [0]>} : vector<2x8x8xf32>, vector<2x8x8xf32>, vector<2x8x8xf32> -> vector<2x8x8xf32>
    "tpu.trace_stop"() : () -> ()
    %cst_42 = arith.constant dense<0xFF800000> : vector<2x8xf32>
    %101 = vector.multi_reduction <maximumf>, %100, %cst_42 [2] : vector<2x8x8xf32> to vector<2x8xf32>
    %102 = vector.shape_cast %101 : vector<2x8xf32> to vector<2x8x1xf32>
    %103 = vector.broadcast %102 : vector<2x8x1xf32> to vector<2x8x8xf32>
    %104 = arith.subf %100, %103 : vector<2x8x8xf32>
    %105 = math.exp %104 : vector<2x8x8xf32>
    %cst_43 = arith.constant dense<0.000000e+00> : vector<2x8xf32>
    %106 = vector.multi_reduction <add>, %105, %cst_43 [2] : vector<2x8x8xf32> to vector<2x8xf32>
    %107 = vector.shape_cast %106 : vector<2x8xf32> to vector<2x8x1xf32>
    %108 = tpu.reciprocal %107 {approx = true} : vector<2x8x1xf32> -> vector<2x8x1xf32>
    %109 = vector.broadcast %108 : vector<2x8x1xf32> to vector<2x8x8xf32>
    %110 = arith.mulf %105, %109 : vector<2x8x8xf32>
    "tpu.trace_start"() <{level = 10 : i32, message = "bqk,bkd->bqd"}> : () -> ()
    %cst_44 = arith.constant dense<0.000000e+00> : vector<2x8x8xf32>
    %111 = tpu.matmul %110, %99, %cst_44 {dimension_numbers = #tpu.dot_dimension_numbers<[2], [1], [1], [2], [0, 0, 0, 1, 1, 2], [0], [0]>} : vector<2x8x8xf32>, vector<2x8x8xf32>, vector<2x8x8xf32> -> vector<2x8x8xf32>
    "tpu.trace_stop"() : () -> ()
    %112 = vector.shape_cast %111 : vector<2x8x8xf32> to vector<16x8xf32>
    %c0_45 = arith.constant 0 : index
    %c2 = arith.constant 2 : index
    %c0_46 = arith.constant 0 : index
    %c0_47 = arith.constant 0 : index
    %113 = vector.load %arg7[%c0_45, %c2, %c0_46, %c0_47] : memref<1x4x8x32xf32, #tpu.memory_space<vmem>>, vector<1x1x8x32xf32>
    %114 = vector.shape_cast %113 : vector<1x1x8x32xf32> to vector<8x32xf32>
    %cst_48 = arith.constant dense<0.000000e+00> : vector<16x32xf32>
    %115 = tpu.matmul %112, %114, %cst_48 {dimension_numbers = #tpu.dot_dimension_numbers<[1], [0], [0], [1], [0, 0, 1, 1], [], []>} : vector<16x8xf32>, vector<8x32xf32>, vector<16x32xf32> -> vector<16x32xf32>
    %116 = arith.addf %91, %115 : vector<16x32xf32>
    %117 = vector.extract_strided_slice %40 {offsets = [0, 24], sizes = [16, 8], strides = [1, 1]} : vector<16x96xf32> to vector<16x8xf32>
    %cst_49 = arith.constant 0.353553385 : f32
    %118 = vector.broadcast %cst_49 : f32 to vector<16x8xf32>
    %119 = arith.mulf %117, %118 : vector<16x8xf32>
    %120 = vector.shape_cast %119 : vector<16x8xf32> to vector<2x8x8xf32>
    %121 = vector.extract_strided_slice %40 {offsets = [0, 56], sizes = [16, 8], strides = [1, 1]} : vector<16x96xf32> to vector<16x8xf32>
    %122 = vector.shape_cast %121 : vector<16x8xf32> to vector<2x8x8xf32>
    %123 = vector.extract_strided_slice %40 {offsets = [0, 88], sizes = [16, 8], strides = [1, 1]} : vector<16x96xf32> to vector<16x8xf32>
    %124 = vector.shape_cast %123 : vector<16x8xf32> to vector<2x8x8xf32>
    "tpu.trace_start"() <{level = 10 : i32, message = "bqd,bkd->bqk"}> : () -> ()
    %cst_50 = arith.constant dense<0.000000e+00> : vector<2x8x8xf32>
    %125 = tpu.matmul %120, %122, %cst_50 {dimension_numbers = #tpu.dot_dimension_numbers<[2], [2], [1], [1], [0, 0, 0, 1, 1, 1], [0], [0]>} : vector<2x8x8xf32>, vector<2x8x8xf32>, vector<2x8x8xf32> -> vector<2x8x8xf32>
    "tpu.trace_stop"() : () -> ()
    %cst_51 = arith.constant dense<0xFF800000> : vector<2x8xf32>
    %126 = vector.multi_reduction <maximumf>, %125, %cst_51 [2] : vector<2x8x8xf32> to vector<2x8xf32>
    %127 = vector.shape_cast %126 : vector<2x8xf32> to vector<2x8x1xf32>
    %128 = vector.broadcast %127 : vector<2x8x1xf32> to vector<2x8x8xf32>
    %129 = arith.subf %125, %128 : vector<2x8x8xf32>
    %130 = math.exp %129 : vector<2x8x8xf32>
    %cst_52 = arith.constant dense<0.000000e+00> : vector<2x8xf32>
    %131 = vector.multi_reduction <add>, %130, %cst_52 [2] : vector<2x8x8xf32> to vector<2x8xf32>
    %132 = vector.shape_cast %131 : vector<2x8xf32> to vector<2x8x1xf32>
    %133 = tpu.reciprocal %132 {approx = true} : vector<2x8x1xf32> -> vector<2x8x1xf32>
    %134 = vector.broadcast %133 : vector<2x8x1xf32> to vector<2x8x8xf32>
    %135 = arith.mulf %130, %134 : vector<2x8x8xf32>
    "tpu.trace_start"() <{level = 10 : i32, message = "bqk,bkd->bqd"}> : () -> ()
    %cst_53 = arith.constant dense<0.000000e+00> : vector<2x8x8xf32>
    %136 = tpu.matmul %135, %124, %cst_53 {dimension_numbers = #tpu.dot_dimension_numbers<[2], [1], [1], [2], [0, 0, 0, 1, 1, 2], [0], [0]>} : vector<2x8x8xf32>, vector<2x8x8xf32>, vector<2x8x8xf32> -> vector<2x8x8xf32>
    "tpu.trace_stop"() : () -> ()
    %137 = vector.shape_cast %136 : vector<2x8x8xf32> to vector<16x8xf32>
    %c0_54 = arith.constant 0 : index
    %c3 = arith.constant 3 : index
    %c0_55 = arith.constant 0 : index
    %c0_56 = arith.constant 0 : index
    %138 = vector.load %arg7[%c0_54, %c3, %c0_55, %c0_56] : memref<1x4x8x32xf32, #tpu.memory_space<vmem>>, vector<1x1x8x32xf32>
    %139 = vector.shape_cast %138 : vector<1x1x8x32xf32> to vector<8x32xf32>
    %cst_57 = arith.constant dense<0.000000e+00> : vector<16x32xf32>
    %140 = tpu.matmul %137, %139, %cst_57 {dimension_numbers = #tpu.dot_dimension_numbers<[1], [0], [0], [1], [0, 0, 1, 1], [], []>} : vector<16x8xf32>, vector<8x32xf32>, vector<16x32xf32> -> vector<16x32xf32>
    %141 = arith.addf %116, %140 : vector<16x32xf32>
    %c0_58 = arith.constant 0 : index
    %c0_59 = arith.constant 0 : index
    %c0_60 = arith.constant 0 : index
    %142 = vector.load %arg8[%c0_58, %c0_59, %c0_60] : memref<1x1x32xf32, #tpu.memory_space<vmem>>, vector<1x1x32xf32>
    %143 = vector.shape_cast %142 : vector<1x1x32xf32> to vector<32xf32>
    %144 = vector.shape_cast %143 : vector<32xf32> to vector<1x32xf32>
    %145 = vector.broadcast %144 : vector<1x32xf32> to vector<16x32xf32>
    %146 = arith.addf %141, %145 : vector<16x32xf32>
    %147 = arith.addf %146, %4 : vector<16x32xf32>
    %cst_61 = arith.constant dense<0.000000e+00> : vector<16xf32>
    %148 = vector.multi_reduction <add>, %147, %cst_61 [1] : vector<16x32xf32> to vector<16xf32>
    %149 = vector.shape_cast %148 : vector<16xf32> to vector<16x1xf32>
    %cst_62 = arith.constant 3.200000e+01 : f32
    %150 = vector.broadcast %cst_62 : f32 to vector<16x1xf32>
    %151 = arith.divf %149, %150 : vector<16x1xf32>
    %152 = vector.broadcast %151 : vector<16x1xf32> to vector<16x32xf32>
    %153 = arith.subf %147, %152 : vector<16x32xf32>
    %154 = arith.mulf %153, %153 : vector<16x32xf32>
    %cst_63 = arith.constant dense<0.000000e+00> : vector<16xf32>
    %155 = vector.multi_reduction <add>, %154, %cst_63 [1] : vector<16x32xf32> to vector<16xf32>
    %156 = vector.shape_cast %155 : vector<16xf32> to vector<16x1xf32>
    %cst_64 = arith.constant 3.200000e+01 : f32
    %157 = vector.broadcast %cst_64 : f32 to vector<16x1xf32>
    %158 = arith.divf %156, %157 : vector<16x1xf32>
    %159 = vector.broadcast %151 : vector<16x1xf32> to vector<16x32xf32>
    %160 = arith.subf %147, %159 : vector<16x32xf32>
    %cst_65 = arith.constant 9.99999997E-7 : f32
    %161 = vector.broadcast %cst_65 : f32 to vector<16x1xf32>
    %162 = arith.addf %158, %161 : vector<16x1xf32>
    %163 = math.rsqrt %162 : vector<16x1xf32>
    %164 = vector.broadcast %163 : vector<16x1xf32> to vector<16x32xf32>
    %165 = arith.mulf %160, %164 : vector<16x32xf32>
    %c0_66 = arith.constant 0 : index
    %c0_67 = arith.constant 0 : index
    %c0_68 = arith.constant 0 : index
    %166 = vector.load %arg9[%c0_66, %c0_67, %c0_68] : memref<1x1x32xf32, #tpu.memory_space<vmem>>, vector<1x1x32xf32>
    %167 = vector.shape_cast %166 : vector<1x1x32xf32> to vector<32xf32>
    %168 = vector.shape_cast %167 : vector<32xf32> to vector<1x32xf32>
    %169 = vector.broadcast %168 : vector<1x32xf32> to vector<16x32xf32>
    %170 = arith.mulf %165, %169 : vector<16x32xf32>
    %c0_69 = arith.constant 0 : index
    %c0_70 = arith.constant 0 : index
    %c0_71 = arith.constant 0 : index
    %171 = vector.load %arg10[%c0_69, %c0_70, %c0_71] : memref<1x1x32xf32, #tpu.memory_space<vmem>>, vector<1x1x32xf32>
    %172 = vector.shape_cast %171 : vector<1x1x32xf32> to vector<32xf32>
    %173 = vector.shape_cast %172 : vector<32xf32> to vector<1x32xf32>
    %174 = vector.broadcast %173 : vector<1x32xf32> to vector<16x32xf32>
    %175 = arith.addf %170, %174 : vector<16x32xf32>
    %c0_72 = arith.constant 0 : index
    %c0_73 = arith.constant 0 : index
    %c0_74 = arith.constant 0 : index
    %176 = vector.load %arg11[%c0_72, %c0_73, %c0_74] : memref<1x32x128xf32, #tpu.memory_space<vmem>>, vector<1x32x128xf32>
    %177 = vector.shape_cast %176 : vector<1x32x128xf32> to vector<32x128xf32>
    %cst_75 = arith.constant dense<0.000000e+00> : vector<16x128xf32>
    %178 = tpu.matmul %175, %177, %cst_75 {dimension_numbers = #tpu.dot_dimension_numbers<[1], [0], [0], [1], [0, 0, 1, 1], [], []>} : vector<16x32xf32>, vector<32x128xf32>, vector<16x128xf32> -> vector<16x128xf32>
    %c0_76 = arith.constant 0 : index
    %c0_77 = arith.constant 0 : index
    %c0_78 = arith.constant 0 : index
    %179 = vector.load %arg12[%c0_76, %c0_77, %c0_78] : memref<1x1x128xf32, #tpu.memory_space<vmem>>, vector<1x1x128xf32>
    %180 = vector.shape_cast %179 : vector<1x1x128xf32> to vector<128xf32>
    %181 = vector.shape_cast %180 : vector<128xf32> to vector<1x128xf32>
    %182 = vector.broadcast %181 : vector<1x128xf32> to vector<16x128xf32>
    %183 = arith.addf %178, %182 : vector<16x128xf32>
    %184 = arith.mulf %183, %183 : vector<16x128xf32>
    %185 = arith.mulf %183, %184 : vector<16x128xf32>
    %cst_79 = arith.constant 4.471500e-02 : f32
    %186 = vector.broadcast %cst_79 : f32 to vector<16x128xf32>
    %187 = arith.mulf %186, %185 : vector<16x128xf32>
    %188 = arith.addf %183, %187 : vector<16x128xf32>
    %cst_80 = arith.constant 0.797884583 : f32
    %189 = vector.broadcast %cst_80 : f32 to vector<16x128xf32>
    %190 = arith.mulf %189, %188 : vector<16x128xf32>
    %191 = math.tanh %190 : vector<16x128xf32>
    %cst_81 = arith.constant 1.000000e+00 : f32
    %192 = vector.broadcast %cst_81 : f32 to vector<16x128xf32>
    %193 = arith.addf %192, %191 : vector<16x128xf32>
    %cst_82 = arith.constant 5.000000e-01 : f32
    %194 = vector.broadcast %cst_82 : f32 to vector<16x128xf32>
    %195 = arith.mulf %194, %193 : vector<16x128xf32>
    %196 = arith.mulf %183, %195 : vector<16x128xf32>
    %c0_83 = arith.constant 0 : index
    %c0_84 = arith.constant 0 : index
    %c0_85 = arith.constant 0 : index
    %197 = vector.load %arg13[%c0_83, %c0_84, %c0_85] : memref<1x128x32xf32, #tpu.memory_space<vmem>>, vector<1x128x32xf32>
    %198 = vector.shape_cast %197 : vector<1x128x32xf32> to vector<128x32xf32>
    %cst_86 = arith.constant dense<0.000000e+00> : vector<16x32xf32>
    %199 = tpu.matmul %196, %198, %cst_86 {dimension_numbers = #tpu.dot_dimension_numbers<[1], [0], [0], [1], [0, 0, 1, 1], [], []>} : vector<16x128xf32>, vector<128x32xf32>, vector<16x32xf32> -> vector<16x32xf32>
    %c0_87 = arith.constant 0 : index
    %c0_88 = arith.constant 0 : index
    %c0_89 = arith.constant 0 : index
    %200 = vector.load %arg14[%c0_87, %c0_88, %c0_89] : memref<1x1x32xf32, #tpu.memory_space<vmem>>, vector<1x1x32xf32>
    %201 = vector.shape_cast %200 : vector<1x1x32xf32> to vector<32xf32>
    %202 = vector.shape_cast %201 : vector<32xf32> to vector<1x32xf32>
    %203 = vector.broadcast %202 : vector<1x32xf32> to vector<16x32xf32>
    %204 = arith.addf %199, %203 : vector<16x32xf32>
    %205 = arith.addf %204, %147 : vector<16x32xf32>
    %206 = vector.shape_cast %205 : vector<16x32xf32> to vector<2x8x32xf32>
    %c0_90 = arith.constant 0 : index
    %c0_91 = arith.constant 0 : index
    %c0_92 = arith.constant 0 : index
    %207 = vector.load %arg16[%c0_90, %c0_91, %c0_92] : memref<2x8x32xf32, #tpu.memory_space<vmem>>, vector<2x8x32xf32>
    tpu.vector_store %arg16[%c0_90, %c0_91, %c0_92], %206 {strides = array<i32>} : memref<2x8x32xf32, #tpu.memory_space<vmem>>, vector<2x8x32xf32>,
    %c1_i32 = arith.constant 1 : i32
    %208 = arith.cmpi eq, %arg1, %c1_i32 : i32
    %209 = arith.extui %208 : i1 to i32
    %c0_i32_93 = arith.constant 0 : i32
    %210 = arith.cmpi ne, %209, %c0_i32_93 : i32
    scf.if %210 {
      %c0_94 = arith.constant 0 : index
      %c0_95 = arith.constant 0 : index
      %c0_96 = arith.constant 0 : index
      %211 = vector.load %arg15[%c0_94, %c0_95, %c0_96] : memref<2x8x32xf32, #tpu.memory_space<vmem>>, vector<2x8x32xf32>
      tpu.vector_store %arg15[%c0_94, %c0_95, %c0_96], %206 {strides = array<i32>} : memref<2x8x32xf32, #tpu.memory_space<vmem>>, vector<2x8x32xf32>,
    } else {
    }
    return
  }
  func.func @transform_0(%arg0: i32, %arg1: i32) -> (i32, i32, i32) {
    %c0_i32 = arith.constant 0 : i32
    %c0_i32_0 = arith.constant 0 : i32
    %c0_i32_1 = arith.constant 0 : i32
    return %arg0, %c0_i32, %c0_i32_0 : i32, i32, i32
  }
  func.func @transform_1(%arg0: i32, %arg1: i32) -> (i32, i32, i32) {
    %c0_i32 = arith.constant 0 : i32
    %c0_i32_0 = arith.constant 0 : i32
    %c0_i32_1 = arith.constant 0 : i32
    return %arg1, %c0_i32, %c0_i32_0 : i32, i32, i32
  }
  func.func @transform_2(%arg0: i32, %arg1: i32) -> (i32, i32, i32) {
    %c0_i32 = arith.constant 0 : i32
    %c0_i32_0 = arith.constant 0 : i32
    %c0_i32_1 = arith.constant 0 : i32
    return %arg1, %c0_i32, %c0_i32_0 : i32, i32, i32
  }
  func.func @transform_3(%arg0: i32, %arg1: i32) -> (i32, i32, i32) {
    %c0_i32 = arith.constant 0 : i32
    %c0_i32_0 = arith.constant 0 : i32
    %c0_i32_1 = arith.constant 0 : i32
    return %arg1, %c0_i32, %c0_i32_0 : i32, i32, i32
  }
  func.func @transform_4(%arg0: i32, %arg1: i32) -> (i32, i32, i32) {
    %c0_i32 = arith.constant 0 : i32
    %c0_i32_0 = arith.constant 0 : i32
    %c0_i32_1 = arith.constant 0 : i32
    return %arg1, %c0_i32, %c0_i32_0 : i32, i32, i32
  }
  func.func @transform_5(%arg0: i32, %arg1: i32) -> (i32, i32, i32, i32) {
    %c0_i32 = arith.constant 0 : i32
    %c0_i32_0 = arith.constant 0 : i32
    %c0_i32_1 = arith.constant 0 : i32
    %c0_i32_2 = arith.constant 0 : i32
    return %arg1, %c0_i32, %c0_i32_0, %c0_i32_1 : i32, i32, i32, i32
  }
  func.func @transform_6(%arg0: i32, %arg1: i32) -> (i32, i32, i32) {
    %c0_i32 = arith.constant 0 : i32
    %c0_i32_0 = arith.constant 0 : i32
    %c0_i32_1 = arith.constant 0 : i32
    return %arg1, %c0_i32, %c0_i32_0 : i32, i32, i32
  }
  func.func @transform_7(%arg0: i32, %arg1: i32) -> (i32, i32, i32) {
    %c0_i32 = arith.constant 0 : i32
    %c0_i32_0 = arith.constant 0 : i32
    %c0_i32_1 = arith.constant 0 : i32
    return %arg1, %c0_i32, %c0_i32_0 : i32, i32, i32
  }
  func.func @transform_8(%arg0: i32, %arg1: i32) -> (i32, i32, i32) {
    %c0_i32 = arith.constant 0 : i32
    %c0_i32_0 = arith.constant 0 : i32
    %c0_i32_1 = arith.constant 0 : i32
    return %arg1, %c0_i32, %c0_i32_0 : i32, i32, i32
  }
  func.func @transform_9(%arg0: i32, %arg1: i32) -> (i32, i32, i32) {
    %c0_i32 = arith.constant 0 : i32
    %c0_i32_0 = arith.constant 0 : i32
    %c0_i32_1 = arith.constant 0 : i32
    return %arg1, %c0_i32, %c0_i32_0 : i32, i32, i32
  }
  func.func @transform_10(%arg0: i32, %arg1: i32) -> (i32, i32, i32) {
    %c0_i32 = arith.constant 0 : i32
    %c0_i32_0 = arith.constant 0 : i32
    %c0_i32_1 = arith.constant 0 : i32
    return %arg1, %c0_i32, %c0_i32_0 : i32, i32, i32
  }
  func.func @transform_11(%arg0: i32, %arg1: i32) -> (i32, i32, i32) {
    %c0_i32 = arith.constant 0 : i32
    %c0_i32_0 = arith.constant 0 : i32
    %c0_i32_1 = arith.constant 0 : i32
    return %arg1, %c0_i32, %c0_i32_0 : i32, i32, i32
  }
  func.func @transform_12(%arg0: i32, %arg1: i32) -> (i32, i32, i32) {
    %c0_i32 = arith.constant 0 : i32
    %c0_i32_0 = arith.constant 0 : i32
    %c0_i32_1 = arith.constant 0 : i32
    return %arg1, %c0_i32, %c0_i32_0 : i32, i32, i32
  }
  func.func @transform_13(%arg0: i32, %arg1: i32) -> (i32, i32, i32) {
    %c0_i32 = arith.constant 0 : i32
    %c0_i32_0 = arith.constant 0 : i32
    %c0_i32_1 = arith.constant 0 : i32
    return %arg0, %c0_i32, %c0_i32_0 : i32, i32, i32
  }
}

</mosaic_0001>

<bundles_post_ra>
// kernel: blip2_encoder.1
= control target key start
LH: loop header
LB: loop body
LE: loop exit
PB: predicated region body
PF: predicated region fallthrough
CT: control target
= control target key end

     0   :  { %s3861_s0 = inlined_call_operand.vmem [shape: f32[2,8,32], index: 0, kind: input, shape index: {}]   ;;  %s3862_s1 = inlined_call_operand.vmem [shape: f32[2,1,32], index: 1, kind: input, shape index: {}]   ;;  %s3863_s2 = inlined_call_operand.vmem [shape: f32[2,1,32], index: 2, kind: input, shape index: {}]   ;;  %s3864_s3 = inlined_call_operand.vmem [shape: f32[2,32,96], index: 3, kind: input, shape index: {}]   ;;  %s3865_s4 = inlined_call_operand.vmem [shape: f32[2,1,96], index: 4, kind: input, shape index: {}]   ;;  %s3866_s5 = inlined_call_operand.vmem [shape: f32[2,4,8,32], index: 5, kind: input, shape index: {}]   ;;  %s3867_s6 = inlined_call_operand.vmem [shape: f32[2,1,32], index: 6, kind: input, shape index: {}]   ;;  %s3868_s7 = inlined_call_operand.vmem [shape: f32[2,1,32], index: 7, kind: input, shape index: {}]   ;;  %s3869_s8 = inlined_call_operand.vmem [shape: f32[2,1,32], index: 8, kind: input, shape index: {}]   ;;  %s3870_s9 = inlined_call_operand.vmem [shape: f32[2,32,128], index: 9, kind: input, shape index: {}]   ;;  %s3871_s10 = inlined_call_operand.vmem [shape: f32[2,1,128], index: 10, kind: input, shape index: {}]   ;;  %s3872_s11 = inlined_call_operand.vmem [shape: f32[2,128,32], index: 11, kind: input, shape index: {}]   ;;  %s3873_s12 = inlined_call_operand.vmem [shape: f32[2,1,32], index: 12, kind: input, shape index: {}]   ;;  %s3874_s13 = inlined_call_operand.hbm [shape: f32[2,8,32], index: 13, kind: output, shape index: {}]  }
   0x1   :  { %3879 = sst [smem:[#allocation10_spill]] %s3864_s3 }
   0x2   :  { %3880 = sst [smem:[#allocation11_spill]] %s3866_s5 }
   0x3   :  { %3881 = sst [smem:[#allocation12_spill]] %s3874_s13 }
   0x4   :  { %18 = vsyncpa [#allocation4], 0  ;;  %s3489_s25 = smov 0   ;;  %s3491_s26 = smov 0  }
   0x5   :  { %s3493_s27 = smov 0  }
   0x6 LB: > { %3882 = sst [smem:[#allocation6_spill]] %s3397_s26  ;;  %s33_s29 = sadd.s32 1, %s3397_s26  ;;  %s3401_s27 = sphi %s3493_s27, %s24_s27   ;;  %s3397_s26 = sphi %s3491_s26, %s3899_s26   ;;  %s3393_s25 = sphi %s3489_s25, %s3898_s25  }
   0x7   : > { %3883 = sst [smem:[#allocation7_spill]] %s3401_s27  ;;  %p34_p0 = scmp.ge.s32.totalorder %s33_s29, 2 }
   0x8   : > { %p2908_p1 = scmp.ge.s32.totalorder %s3401_s27, 1  ;;  %p505_p2 = scmp.lt.s32.totalorder %s3401_s27, 3 }
   0x9   : > { %s3901_s29 = smov (%p34_p0, %s33_s29), 0 }
   0xa   : > { %3884 = sst [smem:[#allocation8_spill]] %s3901_s29  ;;  %p506_p3 = pnand %p2908_p1, %p505_p2 }
   0xc   : > { %509 = sbr.rel (%p506_p3) target bundleno = 4264 (0x10a8), region = 72 }
  0x13   : > { %p594_p4 = scmp.lt.s32.totalorder %s3393_s25, 1  ;;  %s3885_s3 = sld [smem:[#allocation10_spill]] }
  0x14   : > { %s3886_s5 = sld [smem:[#allocation11_spill]]  ;;  %p2917_p5 = scmp.ne.s32.totalorder %s3393_s25, 0 }
  0x15   : > { %s3512_s30 = scalar_select %p594_p4, %s3393_s25, 1 }
  0x16   : > { %642 = sbr.rel (%p2917_p5) target bundleno = 29 (0x1d), region = 76  ;;  %v643_v0 = vld [vmem:[%s3861_s0] sm:$0xff] (!%p2917_p5)  ;;  %vm645_vm0 = vcmask (!%p2917_p5), 261120   ;;  %v644_v1 = vld [vmem:[%s3861_s0 + $0x8] sm:$0xff] (!%p2917_p5) }
  0x17   : > { %s2970_s20 = sshll.u32 %s3512_s30, 5  ;;  %s618_s27 = scalar_lea.vmem %s3868_s7, %s3512_s30  ;;  %646 = vst.msk [vmem:[#allocation2] sm:$0xff] (!%p2917_p5), %vm645_vm0, %v643_v0  ;;  %647 = vst.msk [vmem:[#allocation2 + $0x8] sm:$0xff] (!%p2917_p5), %vm645_vm0, %v644_v1 }
  0x18   : > { %s621_s23 = scalar_lea.vmem %s3869_s8, %s3512_s30  ;;  %s637_s21 = scalar_lea.vmem %s3873_s12, %s3512_s30 }
  0x19   : > { %s3530_s15 = scalar_lea.vmem %s3885_s3, %s2970_s20  ;;  %s3552_s3 = scalar_lea.vmem %s3870_s9, %s2970_s20 }
  0x1a   : > { %s3535_s26 = scalar_lea.vmem %s3886_s5, %s2970_s20  ;;  %s629_s5 = scalar_lea.vmem %s3871_s10, %s3512_s30 }
  0x1b   : > { %3887 = sst [smem:[#allocation9_spill]] %s3535_s26  ;;  %s2973_s26 = sshll.u32 %s3512_s30, 7 }
  0x1c   : > { %s3562_s17 = scalar_lea.vmem %s3872_s11, %s2973_s26 }
  0x1d PF: > { %vm650_vm1 = vcmask 261120   ;;  %v696_v16 = vld [vmem:[%s3530_s15] sm:$0xff]  ;;  %v697_v17 = vld [vmem:[%s3530_s15 + $0x8] sm:$0xff]  ;;  %v698_v18 = vld [vmem:[%s3530_s15 + $0x10] sm:$0xff]  ;;  %s3888_s29 = scalar_lea.vmem %s3862_s1, %s3512_s30  ;;  %s3889_s16 = scalar_lea.vmem %s3863_s2, %s3512_s30  ;;  %v3403_v38 = vmov 0.0   ;;  %vm3404_vm2 = vmmov 0  }
  0x1e   : > { %v3575_v2 = vld [vmem:[#allocation2] sm:$0xff]  ;;  %v3577_v3 = vld [vmem:[#allocation2 + $0x8] sm:$0xff]  ;;  %v3205_v19 = vpack.c.bf16 %v697_v17, %v696_v16  ;;  %v699_v20 = vld [vmem:[%s3530_s15 + $0x18] sm:$0xff]  ;;  %3089 = vmatprep.subr.mxu0 %v3403_v38  ;;  %3091 = vmatprep.mubr.msk.f32.mxu0 %vm3404_vm2, %v3403_v38  ;;  %s3890_s22 = scalar_lea.vmem %s3865_s4, %s3512_s30  ;;  %s3405_s20 = smov 96   ;;  %vm793_vm3 = vcmask 64512  }
  0x1f   : > { %v651_v4 = vsel %vm650_vm1, %v3575_v2, 0.0  ;;  %v654_v5 = vsel %vm650_vm1, %v3577_v3, 0.0  ;;  %v3209_v21 = vpack.c.bf16 %v699_v20, %v698_v18  ;;  %v2918_v29 = vld [vmem:[%s3888_s29] ss:$0 sm:$0xff]  ;;  %s3406_s24 = smov 64   ;;  %s3407_s14 = smov 88  }
  0x20   : > { %652 = vadd.xlane.f32.xlu0 %v651_v4  ;;  %3206 = vmatprep.subr.bf16.mxu1 %v3205_v19  ;;  %v2919_v31 = vld [vmem:[%s3889_s16] ss:$0 sm:$0xff]  ;;  %s3408_s26 = smov 120   ;;  %s3409_s28 = smov 80  }
  0x21   : > { %3208 = vmatpush3.bf16.msra.mxu1 %v3205_v19  ;;  %v2920_v39 = vld [vmem:[%s3890_s22] ss:$0 sm:$0xff]  ;;  %s3410_s29 = smov 56   ;;  %s3411_s15 = smov 112  }
  0x22   : > { %3210 = vmatprep.subr.bf16.mxu1 %v3209_v21  ;;  %s3412_s13 = smov 48   ;;  %s3413_s16 = smov 72  }
  0x23   : > { %s3414_s19 = smov 104   ;;  %s3891_s18 = sld [smem:[#allocation9_spill]] }
  0x24   : > { %655 = vadd.xlane.f32.xlu0 %v654_v5  ;;  %s3415_s22 = smov 40   ;;  %p2965_p6 = scmp.ne.s32.totalorder %s3393_s25, 1 }
  0x25   : > { %3212 = vmatpush3.bf16.msra.mxu1 %v3209_v21 }
  0x26   : > { %3059 = vmatprep.subr.mxu1 %v3403_v38 }
  0xad   : > { %v653_v6 = vpop.xlane.xlu0 %652 }
  0xae   : > { %v658_v7 = vmul.f32 0.03125, %v653_v6 }
  0xb0   : > { %v660_v8 = vsub.f32 %v3575_v2, %v658_v7 }
  0xb1   : > { %v656_v9 = vpop.xlane.xlu0 %655 }
  0xb2   : > { %v659_v10 = vmul.f32 0.03125, %v656_v9  ;;  %v662_v11 = vmul.f32 %v660_v8, %v660_v8 }
  0xb4   : > { %v661_v12 = vsub.f32 %v3577_v3, %v659_v10  ;;  %v664_v13 = vsel %vm650_vm1, %v662_v11, 0.0 }
  0xb5   : > { %665 = vadd.xlane.f32.xlu1 %v664_v13 }
  0xb6   : > { %v663_v14 = vmul.f32 %v661_v12, %v661_v12 }
  0xb8   : > { %v667_v15 = vsel %vm650_vm1, %v663_v14, 0.0 }
  0xb9   : > { %668 = vadd.xlane.f32.xlu1 %v667_v15 }
 0x142   : > { %v666_v22 = vpop.xlane.xlu1 %665 }
 0x143   : > { %v670_v23 = vmul.f32 0.03125, %v666_v22 }
 0x145   : > { %v672_v24 = vadd.f32 1e-06, %v670_v23 }
 0x146   : > { %v669_v25 = vpop.xlane.xlu1 %668 }
 0x147   : > { %3305 = vrsqrt.f32 %v672_v24  ;;  %v671_v26 = vmul.f32 0.03125, %v669_v25 }
 0x149   : > { %v673_v27 = vadd.f32 1e-06, %v671_v26 }
 0x14b   : > { %3307 = vrsqrt.f32 %v673_v27 }
 0x151   : > { %v3306_v28 = vpop.eup %3305 }
 0x152   : > { %v676_v30 = vmul.f32 %v3306_v28, %v660_v8 }
 0x154   : > { %v685_v32 = vmul.f32 %v2918_v29, %v676_v30 }
 0x155   : > { %v3308_v33 = vpop.eup %3307 }
 0x156   : > { %v677_v34 = vmul.f32 %v3308_v33, %v661_v12  ;;  %v694_v35 = vadd.f32 %v2919_v31, %v685_v32 }
 0x158   : > { %v686_v36 = vmul.f32 %v2918_v29, %v677_v34  ;;  %3056 = vmatprep.mubr.msk.f32.mxu1 %vm650_vm1, %v694_v35 }
 0x15a   : > { %v695_v37 = vadd.f32 %v2919_v31, %v686_v36 }
 0x15c   : > { %3057 = vmatmul.mubr.msk.f32.vlgmr.msra.gmra.mrb[0].mxu1 %vm650_vm1, %v695_v37 }
 0x15d   : > { %3061 = vmatprep.mubr.msk.f32.mxu1 %vm3404_vm2, %v3403_v38 }
 0x22f   : > { %v3058_v40 = vpop.f32.mrb[0].mxu1 }
 0x230   : > { %v3614_v41 = vadd.f32 %v3058_v40, %v2920_v39  ;;  %v779_v42 = vpop.f32.mrb[1].mxu1 }
 0x231   : > { %v3616_v43 = vadd.f32 %v2920_v39, %v779_v42 }
 0x232   : > { %870 = vrot.lane.b32.xlu1 %v3614_v41, %s3405_s20  ;;  %v3631_v47 = vmul.f32 0.35355338, %v3614_v41 }
 0x233   : > { %791 = vrot.lane.b32.xlu0 %v3616_v43, %s3405_s20  ;;  %v3622_v45 = vmul.f32 0.35355338, %v3616_v43 }
 0x2a4   : > { %v871_v46 = vpop.permute.xlu1 %870 }
 0x2a5   : > { %v792_v44 = vpop.permute.xlu0 %791 }
 0x2a6   : > { %3060 = vmatpush3.xpose.msk.msra.mxu1 %vm793_vm3, %v792_v44 }
 0x2a7   : > { %3064 = vmatprep.subr.mxu1 %v3403_v38 }
 0x2a9   : > { %3062 = vmatmul.mubr.msk.f32.vlgmr.msra.gmra.mrb[2].mxu1 %vm793_vm3, %v3622_v45 }
 0x2aa   : > { %3065 = vmatpush3.xpose.msk.msra.mxu1 %vm793_vm3, %v871_v46  ;;  %3066 = vmatprep.mubr.msk.f32.mxu1 %vm3404_vm2, %v3403_v38 }
 0x2ab   : > { %3069 = vmatprep.subr.mxu1 %v3403_v38 }
 0x2ad   : > { %3067 = vmatmul.mubr.msk.f32.vlgmr.msra.gmra.mrb[4].mxu1 %vm793_vm3, %v3631_v47 }
 0x2ae   : > { %3071 = vmatprep.mubr.msk.f32.mxu1 %vm3404_vm2, %v3403_v38 }
 0x37c   : > { %v865_v48 = vpop.f32.mrb[2].mxu1 }
 0x37d   : > { %v3063_v49 = vpop.f32.mrb[3].mxu1  ;;  %v947_v50 = vsel %vm793_vm3, %v865_v48, -inf }
 0x37e   : > { %948 = vmax.xlane.f32.xlu1 %v947_v50 }
 0x380   : > { %v943_v51 = vpop.f32.mrb[4].mxu1 }
 0x381   : > { %v3068_v52 = vpop.f32.mrb[5].mxu1  ;;  %v950_v53 = vsel %vm793_vm3, %v943_v51, -inf }
 0x382   : > { %951 = vmax.xlane.f32.xlu0 %v950_v53 }
 0x38f   : > { %1045 = vrot.lane.b32.xlu1 %v3614_v41, %s3406_s24 }
 0x393   : > { %1124 = vrot.lane.b32.xlu1 %v3616_v43, %s3407_s14 }
 0x397   : > { %1122 = vrot.lane.b32.xlu1 %v3622_v45, %s3408_s26 }
 0x40b   : > { %v949_v54 = vpop.xlane.xlu1 %948 }
 0x40c   : > { %v953_v55 = vsub.f32 %v865_v48, %v949_v54 }
 0x40e   : > { %v955_v56 = vmul.f32 1.442695, %v953_v55 }
 0x40f   : > { %v952_v57 = vpop.xlane.xlu0 %951  ;;  %v1046_v0 = vpop.permute.xlu1 %1045 }
 0x410   : > { %3309 = vpow2.f32 %v955_v56  ;;  %v954_v58 = vsub.f32 %v943_v51, %v952_v57 }
 0x412   : > { %v957_v59 = vmul.f32 1.442695, %v954_v58 }
 0x413   : > { %v1125_v1 = vpop.permute.xlu1 %1124 }
 0x414   : > { %3311 = vpow2.f32 %v957_v59  ;;  %v2935_v59 = vld [vmem:[%s3891_s18 + $0x8] sm:$0xff] }
 0x417   : > { %v1123_v4 = vpop.permute.xlu1 %1122 }
 0x41a   : > { %v3310_v60 = vpop.eup %3309 }
 0x41b   : > { %v959_v61 = vsel %vm793_vm3, %v3310_v60, 0.0 }
 0x41c   : > { %960 = vadd.xlane.f32.xlu0 %v959_v61 }
 0x41e   : > { %v3312_v62 = vpop.eup %3311 }
 0x41f   : > { %v962_v63 = vsel %vm793_vm3, %v3312_v62, 0.0 }
 0x420   : > { %963 = vadd.xlane.f32.xlu1 %v962_v63 }
 0x431   : > { %1200 = vrot.lane.b32.xlu1 %v3631_v47, %s3408_s26 }
 0x432   : > { %969 = vrot.lane.b32.xlu0 %v3616_v43, %s3406_s24 }
 0x435   : > { %1618 = vrot.lane.b32.xlu1 %v3616_v43, %s3409_s28 }
 0x436   : > { %1202 = vrot.lane.b32.xlu0 %v3614_v41, %s3407_s14  ;;  %s3892_s14 = scalar_lea.vmem %s3867_s6, %s3512_s30 }
 0x4a9   : > { %v961_v5 = vpop.xlane.xlu0 %960 }
 0x4aa   : > { %3313 = vrcp.f32 %v961_v5 }
 0x4ad   : > { %v964_v6 = vpop.xlane.xlu1 %963  ;;  %v970_v7 = vpop.permute.xlu0 %969 }
 0x4ae   : > { %3315 = vrcp.f32 %v964_v6  ;;  %3070 = vmatpush3.msra.mxu1 %v970_v7 }
 0x4af   : > { %3074 = vmatprep.subr.mxu1 %v3403_v38 }
 0x4b1   : > { %v1203_v12 = vpop.permute.xlu0 %1202  ;;  %v1201_v13 = vpop.permute.xlu1 %1200 }
 0x4b4   : > { %v3314_v8 = vpop.eup %3313 }
 0x4b5   : > { %v967_v9 = vmul.f32 %v3314_v8, %v3310_v60  ;;  %v1619_v30 = vpop.permute.xlu1 %1618  ;;  %v1121_v60 = vld [vmem:[%s3891_s18] sm:$0xff] }
 0x4b7   : > { %3072 = vmatmul.mubr.msk.f32.vlgmr.msra.gmra.mrb[6].mxu1 %vm793_vm3, %v967_v9 }
 0x4b8   : > { %v3316_v10 = vpop.eup %3315  ;;  %3075 = vmatpush3.msra.mxu1 %v1046_v0  ;;  %3076 = vmatprep.mubr.msk.f32.mxu1 %vm3404_vm2, %v3403_v38 }
 0x4b9   : > { %v968_v11 = vmul.f32 %v3316_v10, %v3312_v62  ;;  %3079 = vmatprep.subr.mxu1 %v3403_v38 }
 0x4bb   : > { %3077 = vmatmul.mubr.msk.f32.vlgmr.msra.gmra.mrb[8].mxu1 %vm793_vm3, %v968_v11 }
 0x4bc   : > { %3081 = vmatprep.mubr.msk.f32.mxu1 %vm3404_vm2, %v3403_v38 }
 0x4bf   : > { %3080 = vmatpush3.xpose.msk.msra.mxu1 %vm793_vm3, %v1125_v1 }
 0x4c0   : > { %3084 = vmatprep.subr.mxu1 %v3403_v38 }
 0x4c2   : > { %3082 = vmatmul.mubr.msk.f32.vlgmr.msra.gmra.mrb[10].mxu1 %vm793_vm3, %v1123_v4 }
 0x4c3   : > { %3085 = vmatpush3.xpose.msk.msra.mxu1 %vm793_vm3, %v1203_v12  ;;  %3086 = vmatprep.mubr.msk.f32.mxu1 %vm3404_vm2, %v3403_v38  ;;  %v2946_v12 = vld [vmem:[%s3891_s18 + $0x10] sm:$0xff] }
 0x4c4   : > { %3094 = vmatprep.subr.mxu1 %v3403_v38 }
 0x4c6   : > { %3087 = vmatmul.mubr.msk.f32.vlgmr.msra.gmra.mrb[12].mxu1 %vm793_vm3, %v1201_v13 }
 0x4c7   : > { %3096 = vmatprep.mubr.msk.f32.mxu1 %vm3404_vm2, %v3403_v38 }
 0x58a   : > { %v3668_v14 = vpop.f32.mrb[6].mxu1 }
 0x58b   : > { %v3073_v15 = vpop.f32.mrb[7].mxu1 }
 0x58e   : > { %v3670_v16 = vpop.f32.mrb[8].mxu1 }
 0x58f   : > { %v3078_v17 = vpop.f32.mrb[9].mxu1 }
 0x595   : > { %v1196_v18 = vpop.f32.mrb[10].mxu1 }
 0x596   : > { %v3083_v19 = vpop.f32.mrb[11].mxu1  ;;  %v1278_v29 = vsel %vm793_vm3, %v1196_v18, -inf }
 0x599   : > { %v1274_v20 = vpop.f32.mrb[12].mxu1 }
 0x59a   : > { %v3088_v21 = vpop.f32.mrb[13].mxu1  ;;  %v1281_v22 = vsel %vm793_vm3, %v1274_v20, -inf }
 0x59b   : > { %1282 = vmax.xlane.f32.xlu0 %v1281_v22 }
 0x5b1   : > { %1376 = vrot.lane.b32.xlu0 %v3614_v41, %s3410_s29 }
 0x5b5   : > { %1616 = vrot.lane.b32.xlu0 %v3622_v45, %s3411_s15 }
 0x5b9   : > { %1694 = vrot.lane.b32.xlu0 %v3631_v47, %s3411_s15 }
 0x628   : > { %v1283_v23 = vpop.xlane.xlu0 %1282 }
 0x629   : > { %v1285_v24 = vsub.f32 %v1274_v20, %v1283_v23 }
 0x62b   : > { %v1288_v25 = vmul.f32 1.442695, %v1285_v24 }
 0x62c   : > { %v1377_v26 = vpop.permute.xlu0 %1376 }
 0x62d   : > { %3317 = vpow2.f32 %v1288_v25  ;;  %3095 = vmatpush3.msra.mxu1 %v1377_v26 }
 0x62e   : > { %3109 = vmatprep.subr.mxu1 %v3403_v38 }
 0x630   : > { %v1617_v34 = vpop.permute.xlu0 %1616 }
 0x634   : > { %v1695_v36 = vpop.permute.xlu0 %1694 }
 0x637   : > { %v3318_v27 = vpop.eup %3317 }
 0x638   : > { %v1293_v28 = vsel %vm793_vm3, %v3318_v27, 0.0 }
 0x639   : > { %1294 = vadd.xlane.f32.xlu1 %v1293_v28 }
 0x64a   : > { %1696 = vrot.lane.b32.xlu1 %v3614_v41, %s3409_s28 }
 0x66e   : > { %1279 = vmax.xlane.f32.xlu1 %v1278_v29 }
 0x6c6   : > { %v1295_v31 = vpop.xlane.xlu1 %1294 }
 0x6c7   : > { %3319 = vrcp.f32 %v1295_v31 }
 0x6ca   : > { %v1697_v35 = vpop.permute.xlu1 %1696 }
 0x6d1   : > { %v3320_v32 = vpop.eup %3319 }
 0x6d2   : > { %v1299_v33 = vmul.f32 %v3320_v32, %v3318_v27 }
 0x6d4   : > { %3097 = vmatmul.mubr.msk.f32.vlgmr.msra.gmra.mrb[14].mxu1 %vm793_vm3, %v1299_v33 }
 0x6d5   : > { %3110 = vmatpush3.xpose.msk.msra.mxu1 %vm793_vm3, %v1619_v30  ;;  %3111 = vmatprep.mubr.msk.f32.mxu1 %vm3404_vm2, %v3403_v38 }
 0x6d6   : > { %3114 = vmatprep.subr.mxu1 %v3403_v38 }
 0x6d8   : > { %3112 = vmatmul.mubr.msk.f32.vlgmr.msra.gmra.mrb[16].mxu1 %vm793_vm3, %v1617_v34 }
 0x6d9   : > { %3115 = vmatpush3.xpose.msk.msra.mxu1 %vm793_vm3, %v1697_v35  ;;  %3116 = vmatprep.mubr.msk.f32.mxu1 %vm3404_vm2, %v3403_v38 }
 0x6da   : > { %3124 = vmatprep.subr.mxu1 %v3403_v38 }
 0x6dc   : > { %3117 = vmatmul.mubr.msk.f32.vlgmr.msra.gmra.mrb[18].mxu1 %vm793_vm3, %v1695_v36 }
 0x6dd   : > { %3126 = vmatprep.mubr.msk.f32.mxu1 %vm3404_vm2, %v3403_v38 }
 0x6fb   : > { %v1280_v37 = vpop.xlane.xlu1 %1279 }
 0x6fc   : > { %v1284_v39 = vsub.f32 %v1196_v18, %v1280_v37 }
 0x6fe   : > { %v1286_v40 = vmul.f32 1.442695, %v1284_v39 }
 0x700   : > { %3321 = vpow2.f32 %v1286_v40 }
 0x70a   : > { %v3322_v42 = vpop.eup %3321 }
 0x70b   : > { %v1290_v44 = vsel %vm793_vm3, %v3322_v42, 0.0 }
 0x70c   : > { %1291 = vadd.xlane.f32.xlu0 %v1290_v44 }
 0x722   : > { %1300 = vrot.lane.b32.xlu0 %v3616_v43, %s3410_s29 }
 0x726   : > { %1870 = vrot.lane.b32.xlu0 %v3614_v41, %s3412_s13 }
 0x72a   : > { %2033 = vrot.lane.b32.xlu0 %v3616_v43, %s3413_s16 }
 0x72e   : > { %2111 = vrot.lane.b32.xlu0 %v3614_v41, %s3413_s16 }
 0x732   : > { %2031 = vrot.lane.b32.xlu0 %v3622_v45, %s3414_s19 }
 0x799   : > { %v1292_v46 = vpop.xlane.xlu0 %1291 }
 0x79a   : > { %3323 = vrcp.f32 %v1292_v46 }
 0x79d   : > { %v1301_v48 = vpop.permute.xlu0 %1300 }
 0x79e   : > { %3090 = vmatpush3.msra.mxu0 %v1301_v48 }
 0x79f   : > { %3099 = vmatprep.subr.mxu0 %v2935_v59 }
 0x7a1   : > { %v1871_v49 = vpop.permute.xlu0 %1870 }
 0x7a2   : > { %3125 = vmatpush3.msra.mxu1 %v1871_v49 }
 0x7a3   : > { %3134 = vmatprep.subr.mxu1 %v3403_v38 }
 0x7a4   : > { %v3324_v50 = vpop.eup %3323 }
 0x7a5   : > { %v1298_v51 = vmul.f32 %v3324_v50, %v3322_v42  ;;  %v2034_v15 = vpop.permute.xlu0 %2033 }
 0x7a7   : > { %3092 = vmatmul.mubr.msk.f32.vlgmr.msra.gmra.mrb[0].mxu0 %vm793_vm3, %v1298_v51  ;;  %v1448_v52 = vpop.f32.mrb[14].mxu1 }
 0x7a8   : > { %v3098_v53 = vpop.f32.mrb[15].mxu1  ;;  %3100 = vmatpush3.msra.mxu0 %v2935_v59 }
 0x7a9   : > { %3104 = vmatprep.subr.mxu0 %v1121_v60  ;;  %v2112_v19 = vpop.permute.xlu0 %2111  ;;  %v2955_v53 = vld [vmem:[%s3891_s18 + $0x18] sm:$0xff] }
 0x7ab   : > { %v1690_v54 = vpop.f32.mrb[16].mxu1 }
 0x7ac   : > { %v3113_v55 = vpop.f32.mrb[17].mxu1  ;;  %v1772_v45 = vsel %vm793_vm3, %v1690_v54, -inf }
 0x7ad   : > { %1773 = vmax.xlane.f32.xlu1 %v1772_v45  ;;  %v2032_v20 = vpop.permute.xlu0 %2031 }
 0x7af   : > { %v1768_v56 = vpop.f32.mrb[18].mxu1 }
 0x7b0   : > { %v3118_v57 = vpop.f32.mrb[19].mxu1  ;;  %v1775_v58 = vsel %vm793_vm3, %v1768_v56, -inf }
 0x7b1   : > { %1776 = vmax.xlane.f32.xlu1 %v1775_v58 }
 0x83a   : > { %v1774_v61 = vpop.xlane.xlu1 %1773 }
 0x83b   : > { %v1778_v62 = vsub.f32 %v1690_v54, %v1774_v61 }
 0x83d   : > { %v1780_v63 = vmul.f32 1.442695, %v1778_v62 }
 0x83e   : > { %v1777_v0 = vpop.xlane.xlu1 %1776 }
 0x83f   : > { %3325 = vpow2.f32 %v1780_v63  ;;  %v1779_v1 = vsub.f32 %v1768_v56, %v1777_v0  ;;  %v2958_v56 = vld [vmem:[%s3892_s14] ss:$0 sm:$0xff] }
 0x841   : > { %v1782_v4 = vmul.f32 1.442695, %v1779_v1 }
 0x843   : > { %3327 = vpow2.f32 %v1782_v4 }
 0x849   : > { %v3326_v5 = vpop.eup %3325 }
 0x84a   : > { %v1784_v6 = vsel %vm793_vm3, %v3326_v5, 0.0 }
 0x84b   : > { %1785 = vadd.xlane.f32.xlu1 %v1784_v6 }
 0x84d   : > { %v3328_v7 = vpop.eup %3327 }
 0x84e   : > { %v1787_v8 = vsel %vm793_vm3, %v3328_v7, 0.0 }
 0x84f   : > { %1788 = vadd.xlane.f32.xlu1 %v1787_v8 }
 0x860   : > { %1794 = vrot.lane.b32.xlu1 %v3616_v43, %s3412_s13 }
 0x864   : > { %2109 = vrot.lane.b32.xlu1 %v3631_v47, %s3414_s19 }
 0x87a   : > { %v1372_v9 = vpop.f32.mrb[0].mxu0 }
 0x87b   : > { %v3093_v10 = vpop.f32.mrb[1].mxu0  ;;  %3101 = vmatprep.mubr.msk.f32.mxu0 %vm793_vm3, %v1372_v9 }
 0x87c   : > { %3102 = vmatmul.mubr.msk.f32.vlgmr.msra.gmra.mrb[2].mxu0 %vm793_vm3, %v1448_v52 }
 0x87d   : > { %3106 = vmatprep.mubr.msk.f32.mxu0 %vm793_vm3, %v3668_v14  ;;  %3105 = vmatpush3.msra.mxu0 %v1121_v60 }
 0x87e   : > { %3119 = vmatprep.subr.mxu0 %v3403_v38 }
 0x884   : > { %3107 = vmatmul.mubr.msk.f32.vlgmr.msra.gmra.mrb[2].mxu0 %vm793_vm3, %v3670_v16 }
 0x885   : > { %3121 = vmatprep.mubr.msk.f32.mxu0 %vm3404_vm2, %v3403_v38 }
 0x8d8   : > { %v1786_v11 = vpop.xlane.xlu1 %1785 }
 0x8d9   : > { %3329 = vrcp.f32 %v1786_v11  ;;  %v2501_v11 = vld [vmem:[%s3552_s3] sm:$0xff] }
 0x8dc   : > { %v1789_v47 = vpop.xlane.xlu1 %1788 }
 0x8dd   : > { %3331 = vrcp.f32 %v1789_v47  ;;  %v2502_v47 = vld [vmem:[%s3552_s3 + $0x8] sm:$0xff] }
 0x8e0   : > { %v1795_v13 = vpop.permute.xlu1 %1794 }
 0x8e1   : > { %3120 = vmatpush3.msra.mxu0 %v1795_v13  ;;  %v2503_v13 = vld [vmem:[%s3552_s3 + $0x10] sm:$0xff] }
 0x8e2   : > { %3129 = vmatprep.subr.mxu0 %v2946_v12 }
 0x8e3   : > { %v3330_v17 = vpop.eup %3329 }
 0x8e4   : > { %v1792_v14 = vmul.f32 %v3330_v17, %v3326_v5  ;;  %v2110_v25 = vpop.permute.xlu1 %2109 }
 0x8e6   : > { %3122 = vmatmul.mubr.msk.f32.vlgmr.msra.gmra.mrb[4].mxu0 %vm793_vm3, %v1792_v14 }
 0x8e7   : > { %v3332_v18 = vpop.eup %3331  ;;  %3130 = vmatpush3.msra.mxu0 %v2946_v12  ;;  %v3213_v12 = vpack.c.bf16 %v2502_v47, %v2501_v11 }
 0x8e8   : > { %v1793_v16 = vmul.f32 %v3332_v18, %v3328_v7  ;;  %3139 = vmatprep.subr.mxu0 %v3403_v38 }
 0x8ea   : > { %3127 = vmatmul.mubr.msk.f32.vlgmr.msra.gmra.mrb[20].mxu1 %vm793_vm3, %v1793_v16 }
 0x8eb   : > { %3135 = vmatpush3.xpose.msk.msra.mxu1 %vm793_vm3, %v2034_v15  ;;  %3136 = vmatprep.mubr.msk.f32.mxu1 %vm3404_vm2, %v3403_v38  ;;  %v2504_v15 = vld [vmem:[%s3552_s3 + $0x18] sm:$0xff] }
 0x8ec   : > { %3144 = vmatprep.subr.mxu1 %v3403_v38  ;;  %v3217_v17 = vpack.c.bf16 %v2504_v15, %v2503_v13 }
 0x8ee   : > { %3137 = vmatmul.mubr.msk.f32.vlgmr.msra.gmra.mrb[22].mxu1 %vm793_vm3, %v2032_v20 }
 0x8ef   : > { %3146 = vmatprep.mubr.msk.f32.mxu1 %vm3404_vm2, %v3403_v38 }
 0x9b9   : > { %v1866_v21 = vpop.f32.mrb[4].mxu0 }
 0x9ba   : > { %v3123_v22 = vpop.f32.mrb[5].mxu0  ;;  %3131 = vmatprep.mubr.msk.f32.mxu0 %vm793_vm3, %v1866_v21 }
 0x9bd   : > { %v1942_v23 = vpop.f32.mrb[20].mxu1 }
 0x9be   : > { %v3128_v24 = vpop.f32.mrb[21].mxu1  ;;  %3132 = vmatmul.mubr.msk.f32.vlgmr.msra.gmra.mrb[2].mxu0 %vm793_vm3, %v1942_v23  ;;  %v2959_v23 = vld [vmem:[%s618_s27] ss:$0 sm:$0xff] }
 0x9bf   : > { %3140 = vmatpush3.xpose.msk.msra.mxu0 %vm793_vm3, %v2112_v19  ;;  %3141 = vmatprep.mubr.msk.f32.mxu0 %vm3404_vm2, %v3403_v38 }
 0x9c0   : > { %3149 = vmatprep.subr.mxu0 %v3403_v38 }
 0x9c1   : > { %v2105_v26 = vpop.f32.mrb[22].mxu1 }
 0x9c2   : > { %v3138_v27 = vpop.f32.mrb[23].mxu1  ;;  %3142 = vmatmul.mubr.msk.f32.vlgmr.msra.gmra.mrb[6].mxu0 %vm793_vm3, %v2110_v25  ;;  %v2187_v28 = vsel %vm793_vm3, %v2105_v26, -inf }
 0x9c3   : > { %2188 = vmax.xlane.f32.xlu0 %v2187_v28  ;;  %3151 = vmatprep.mubr.msk.f32.mxu0 %vm3404_vm2, %v3403_v38  ;;  %v2960_v28 = vld [vmem:[%s621_s23] ss:$0 sm:$0xff] }
 0xa50   : > { %v2189_v29 = vpop.xlane.xlu0 %2188 }
 0xa51   : > { %v2193_v30 = vsub.f32 %v2105_v26, %v2189_v29 }
 0xa53   : > { %v2195_v31 = vmul.f32 1.442695, %v2193_v30 }
 0xa55   : > { %3333 = vpow2.f32 %v2195_v31 }
 0xa5f   : > { %v3334_v32 = vpop.eup %3333 }
 0xa60   : > { %v2199_v33 = vsel %vm793_vm3, %v3334_v32, 0.0 }
 0xa61   : > { %2200 = vadd.xlane.f32.xlu0 %v2199_v33  ;;  %v2612_v33 = vld [vmem:[%s3562_s17 + $0x8] sm:$0xff] }
 0xa95   : > { %v2183_v34 = vpop.f32.mrb[6].mxu0 }
 0xa96   : > { %v3143_v35 = vpop.f32.mrb[7].mxu0  ;;  %v2190_v36 = vsel %vm793_vm3, %v2183_v34, -inf }
 0xa97   : > { %2191 = vmax.xlane.f32.xlu1 %v2190_v36  ;;  %v2613_v35 = vld [vmem:[%s3562_s17 + $0x10] sm:$0xff]  ;;  %v2614_v36 = vld [vmem:[%s3562_s17 + $0x18] sm:$0xff] }
 0xaa8   : > { %2285 = vrot.lane.b32.xlu1 %v3614_v41, %s3415_s22 }
 0xaee   : > { %v2201_v46 = vpop.xlane.xlu0 %2200 }
 0xb24   : > { %v2192_v37 = vpop.xlane.xlu1 %2191 }
 0xb25   : > { %v2194_v39 = vsub.f32 %v2183_v34, %v2192_v37  ;;  %v3225_v37 = vpack.c.bf16 %v2614_v36, %v2613_v35 }
 0xb27   : > { %v2197_v40 = vmul.f32 1.442695, %v2194_v39  ;;  %v2615_v39 = vld [vmem:[%s3562_s17 + $0x20] sm:$0xff] }
 0xb28   : > { %v2286_v38 = vpop.permute.xlu1 %2285 }
 0xb29   : > { %3335 = vpow2.f32 %v2197_v40  ;;  %3150 = vmatpush3.msra.mxu0 %v2286_v38  ;;  %v2616_v40 = vld [vmem:[%s3562_s17 + $0x28] sm:$0xff] }
 0xb2a   : > { %3337 = vrcp.f32 %v2201_v46  ;;  %3154 = vmatprep.subr.mxu0 %v2955_v53  ;;  %v3229_v38 = vpack.c.bf16 %v2616_v40, %v2615_v39 }
 0xb33   : > { %v3336_v42 = vpop.eup %3335 }
 0xb34   : > { %v2202_v44 = vsel %vm793_vm3, %v3336_v42, 0.0  ;;  %v3338_v49 = vpop.eup %3337 }
 0xb35   : > { %2203 = vadd.xlane.f32.xlu0 %v2202_v44  ;;  %v2207_v50 = vmul.f32 %v3338_v49, %v3334_v32  ;;  %v2611_v32 = vld [vmem:[%s3562_s17] sm:$0xff]  ;;  %v2618_v44 = vld [vmem:[%s3562_s17 + $0x38] sm:$0xff]  ;;  %v2620_v49 = vld [vmem:[%s3562_s17 + $0x48] sm:$0xff] }
 0xb36   : > { %v3221_v34 = vpack.c.bf16 %v2612_v33, %v2611_v32 }
 0xb4b   : > { %2209 = vrot.lane.b32.xlu0 %v3616_v43, %s3415_s22 }
 0xbc2   : > { %v2204_v48 = vpop.xlane.xlu0 %2203 }
 0xbc3   : > { %3339 = vrcp.f32 %v2204_v48  ;;  %v2619_v48 = vld [vmem:[%s3562_s17 + $0x40] sm:$0xff] }
 0xbc6   : > { %v2210_v41 = vpop.permute.xlu0 %2209 }
 0xbc7   : > { %3145 = vmatpush3.msra.mxu1 %v2210_v41  ;;  %v3237_v41 = vpack.c.bf16 %v2620_v49, %v2619_v48 }
 0xbc8   : > { %3147 = vmatmul.mubr.msk.f32.vlgmr.msra.gmra.mrb[24].mxu1 %vm793_vm3, %v2207_v50  ;;  %3214 = vmatprep.subr.bf16.mxu1 %v3213_v12  ;;  %v2621_v50 = vld [vmem:[%s3562_s17 + $0x50] sm:$0xff] }
 0xbc9   : > { %3216 = vmatpush3.bf16.msra.mxu1 %v3213_v12 }
 0xbca   : > { %3218 = vmatprep.subr.bf16.mxu1 %v3217_v17 }
 0xbcd   : > { %v3340_v51 = vpop.eup %3339  ;;  %3220 = vmatpush3.bf16.msra.mxu1 %v3217_v17 }
 0xbce   : > { %v2208_v52 = vmul.f32 %v3340_v51, %v3336_v42  ;;  %v2617_v42 = vld [vmem:[%s3562_s17 + $0x30] sm:$0xff]  ;;  %v2622_v51 = vld [vmem:[%s3562_s17 + $0x58] sm:$0xff] }
 0xbcf   : > { %v3233_v46 = vpack.c.bf16 %v2618_v44, %v2617_v42 }
 0xbd0   : > { %3152 = vmatmul.mubr.msk.f32.vlgmr.msra.gmra.mrb[8].mxu0 %vm793_vm3, %v2208_v52  ;;  %v3241_v52 = vpack.c.bf16 %v2622_v51, %v2621_v50 }
 0xbd1   : > { %3155 = vmatpush3.msra.mxu0 %v2955_v53  ;;  %v2623_v53 = vld [vmem:[%s3562_s17 + $0x60] sm:$0xff] }
 0xbd2   : > { %3222 = vmatprep.subr.bf16.mxu0 %v3221_v34 }
 0xc9b   : > { %v2281_v54 = vpop.f32.mrb[24].mxu1 }
 0xc9c   : > { %v3148_v43 = vpop.f32.mrb[25].mxu1  ;;  %3156 = vmatprep.mubr.msk.f32.mxu0 %vm793_vm3, %v2281_v54  ;;  %v2624_v54 = vld [vmem:[%s3562_s17 + $0x68] sm:$0xff] }
 0xc9d   : > { %v3245_v43 = vpack.c.bf16 %v2624_v54, %v2623_v53 }
 0xca3   : > { %v2357_v55 = vpop.f32.mrb[8].mxu0 }
 0xca4   : > { %v3153_v45 = vpop.f32.mrb[9].mxu0  ;;  %3157 = vmatmul.mubr.msk.f32.vlgmr.msra.gmra.mrb[2].mxu0 %vm793_vm3, %v2357_v55  ;;  %v2625_v55 = vld [vmem:[%s3562_s17 + $0x70] sm:$0xff] }
 0xca5   : > { %3224 = vmatpush3.bf16.msra.mxu0 %v3221_v34  ;;  %v2626_v45 = vld [vmem:[%s3562_s17 + $0x78] sm:$0xff] }
 0xca6   : > { %3226 = vmatprep.subr.bf16.mxu0 %v3225_v37 }
 0xca9   : > { %3228 = vmatpush3.bf16.msra.mxu0 %v3225_v37 }
 0xcaa   : > { %3230 = vmatprep.subr.bf16.mxu0 %v3229_v38 }
 0xcad   : > { %3232 = vmatpush3.bf16.msra.mxu0 %v3229_v38 }
 0xcae   : > { %3234 = vmatprep.subr.bf16.mxu0 %v3233_v46 }
 0xcb1   : > { %3236 = vmatpush3.bf16.msra.mxu0 %v3233_v46 }
 0xcb2   : > { %3238 = vmatprep.subr.bf16.mxu0 %v3237_v41 }
 0xcb5   : > { %3240 = vmatpush3.bf16.msra.mxu0 %v3237_v41 }
 0xcb6   : > { %3242 = vmatprep.subr.bf16.mxu0 %v3241_v52 }
 0xcb9   : > { %3244 = vmatpush3.bf16.msra.mxu0 %v3241_v52 }
 0xcba   : > { %3246 = vmatprep.subr.bf16.mxu0 %v3245_v43 }
 0xcbd   : > { %3248 = vmatpush3.bf16.msra.mxu0 %v3245_v43 }
 0xd77   : > { %v3158_v57 = vpop.f32.mrb[2].mxu0 }
 0xd78   : > { %v2454_v58 = vadd.f32 %v3158_v57, %v2958_v56  ;;  %v2435_v59 = vpop.f32.mrb[3].mxu0  ;;  %v2961_v57 = vld [vmem:[%s629_s5] ss:$0 sm:$0xff] }
 0xd79   : > { %v2453_v60 = vadd.f32 %v2958_v56, %v2435_v59  ;;  %v3249_v56 = vpack.c.bf16 %v2626_v45, %v2625_v55 }
 0xd7a   : > { %v3762_v61 = vadd.f32 %v2454_v58, %v3577_v3 }
 0xd7b   : > { %v3765_v62 = vadd.f32 %v2453_v60, %v3575_v2  ;;  %3250 = vmatprep.subr.bf16.mxu0 %v3249_v56 }
 0xd7c   : > { %v2460_v63 = vsel %vm650_vm1, %v3762_v61, 0.0  ;;  %3252 = vmatpush3.bf16.msra.mxu0 %v3249_v56 }
 0xd7d   : > { %2461 = vadd.xlane.f32.xlu0 %v2460_v63  ;;  %v2457_v0 = vsel %vm650_vm1, %v3765_v62, 0.0 }
 0xd7e   : > { %2458 = vadd.xlane.f32.xlu1 %v2457_v0 }
 0xe0a   : > { %v2462_v1 = vpop.xlane.xlu0 %2461 }
 0xe0b   : > { %v2464_v4 = vmul.f32 0.03125, %v2462_v1  ;;  %v2459_v5 = vpop.xlane.xlu1 %2458 }
 0xe0c   : > { %v2463_v3 = vmul.f32 0.03125, %v2459_v5 }
 0xe0d   : > { %v2466_v6 = vsub.f32 %v3762_v61, %v2464_v4 }
 0xe0e   : > { %v2465_v2 = vsub.f32 %v3765_v62, %v2463_v3 }
 0xe0f   : > { %v2468_v7 = vmul.f32 %v2466_v6, %v2466_v6 }
 0xe10   : > { %v2467_v8 = vmul.f32 %v2465_v2, %v2465_v2 }
 0xe11   : > { %v2472_v9 = vsel %vm650_vm1, %v2468_v7, 0.0 }
 0xe12   : > { %2473 = vadd.xlane.f32.xlu1 %v2472_v9  ;;  %v2469_v10 = vsel %vm650_vm1, %v2467_v8, 0.0 }
 0xe13   : > { %2470 = vadd.xlane.f32.xlu0 %v2469_v10 }
 0xe9f   : > { %v2474_v14 = vpop.xlane.xlu1 %2473 }
 0xea0   : > { %v2476_v18 = vmul.f32 0.03125, %v2474_v14  ;;  %v2471_v19 = vpop.xlane.xlu0 %2470 }
 0xea1   : > { %v2475_v16 = vmul.f32 0.03125, %v2471_v19 }
 0xea2   : > { %v2478_v20 = vadd.f32 1e-06, %v2476_v18  ;;  %v2964_v18 = vld [vmem:[%s637_s21] ss:$0 sm:$0xff] }
 0xea3   : > { %v2477_v21 = vadd.f32 1e-06, %v2475_v16 }
 0xea4   : > { %3341 = vrsqrt.f32 %v2478_v20 }
 0xea5   : > { %3343 = vrsqrt.f32 %v2477_v21 }
 0xeae   : > { %v3342_v22 = vpop.eup %3341 }
 0xeaf   : > { %v3344_v24 = vpop.eup %3343  ;;  %v2482_v25 = vmul.f32 %v3342_v22, %v2466_v6 }
 0xeb0   : > { %v2481_v26 = vmul.f32 %v3344_v24, %v2465_v2 }
 0xeb1   : > { %v2491_v27 = vmul.f32 %v2959_v23, %v2482_v25 }
 0xeb2   : > { %v2490_v29 = vmul.f32 %v2959_v23, %v2481_v26 }
 0xeb3   : > { %v2500_v31 = vadd.f32 %v2960_v28, %v2491_v27 }
 0xeb4   : > { %v2499_v30 = vadd.f32 %v2960_v28, %v2490_v29 }
 0xeb6   : > { %3167 = vmatprep.mubr.msk.f32.mxu1 %vm650_vm1, %v2499_v30 }
 0xeb7   : > { %3168 = vmatmul.mubr.msk.f32.vlgmr.msra.gmra.mrb[26].mxu1 %vm650_vm1, %v2500_v31 }
 0xf8a   : > { %v3169_v58 = vpop.f32.mrb[26].mxu1 }
 0xf8b   : > { %v2590_v59 = vadd.f32 %v3169_v58, %v2961_v57  ;;  %v2584_v60 = vpop.f32.mrb[27].mxu1 }
 0xf8c   : > { %v2585_v63 = vadd.f32 %v2961_v57, %v2584_v60 }
 0xf8d   : > { %v2594_v0 = vmul.f32 %v2590_v59, %v2590_v59 }
 0xf8e   : > { %v2593_v1 = vmul.f32 %v2585_v63, %v2585_v63 }
 0xf8f   : > { %v2596_v4 = vmul.f32 %v2594_v0, %v2590_v59 }
 0xf90   : > { %v2595_v5 = vmul.f32 %v2593_v1, %v2585_v63 }
 0xf91   : > { %v2598_v3 = vmul.f32 0.044715, %v2596_v4 }
 0xf92   : > { %v2597_v6 = vmul.f32 0.044715, %v2595_v5 }
 0xf93   : > { %v2600_v2 = vadd.f32 %v2598_v3, %v2590_v59 }
 0xf94   : > { %v2599_v7 = vadd.f32 %v2597_v6, %v2585_v63 }
 0xf95   : > { %v2602_v8 = vmul.f32 0.7978846, %v2600_v2 }
 0xf96   : > { %v2601_v9 = vmul.f32 0.7978846, %v2599_v7 }
 0xf97   : > { %3345 = vtanh.f32 %v2602_v8 }
 0xf98   : > { %3347 = vtanh.f32 %v2601_v9 }
 0xfa1   : > { %v3346_v10 = vpop.eup %3345 }
 0xfa2   : > { %v3348_v11 = vpop.eup %3347  ;;  %v2606_v47 = vadd.f32 1.0, %v3346_v10 }
 0xfa3   : > { %v2605_v12 = vadd.f32 1.0, %v3348_v11 }
 0xfa4   : > { %v2608_v13 = vmul.f32 0.5, %v2606_v47 }
 0xfa5   : > { %v2607_v15 = vmul.f32 0.5, %v2605_v12 }
 0xfa6   : > { %v2610_v14 = vmul.f32 %v2608_v13, %v2590_v59 }
 0xfa7   : > { %v2609_v17 = vmul.f32 %v2607_v15, %v2585_v63 }
 0xfa9   : > { %3202 = vmatprep.mubr.f32.mxu0 %v2609_v17 }
 0xfaa   : > { %3203 = vmatmul.mubr.f32.vlgmr.msra.gmra.mrb[10].mxu0 %v2610_v14 }
0x107d   : > { %v3204_v19 = vpop.f32.mrb[10].mxu0  ;;  %2716 = sbr.rel (%p2965_p6) target bundleno = 4228 (0x1084), region = 80 }
0x107e   : > { %v2706_v16 = vadd.f32 %v3204_v19, %v2964_v18  ;;  %v2700_v20 = vpop.f32.mrb[11].mxu0 }
0x107f   : > { %v2701_v21 = vadd.f32 %v2964_v18, %v2700_v20 }
0x1080   : > { %v2710_v22 = vadd.f32 %v2706_v16, %v3762_v61 }
0x1081   : > { %v2709_v23 = vadd.f32 %v2701_v21, %v3765_v62 }
0x1082   : > { %2712 = vst.msk [vmem:[#allocation2 + $0x8] sm:$0xff] %vm650_vm1, %v2710_v22  ;;  %2718 = vst.msk [vmem:[#allocation3 + $0x8] sm:$0xff] (!%p2965_p6), %vm650_vm1, %v2710_v22 }
0x1083   : > { %2711 = vst.msk [vmem:[#allocation2] sm:$0xff] %vm650_vm1, %v2709_v23  ;;  %2717 = vst.msk [vmem:[#allocation3] sm:$0xff] (!%p2965_p6), %vm650_vm1, %v2709_v23 }
0x1084 PF: > { %s3893_s30 = sld [smem:[#allocation7_spill]]  ;;  %s3416_s13 = smov [#allocation3]  }
0x1085   : > { %s2728_s16 = sshll.u32 %s3416_s13, 4  ;;  %s2729_s16 = int_to_ptr.vmem [resolvable:$true] %s2728_s16 }
0x1086   : > { %s3349_s19 = scalar_lea.vmem %s2729_s16, 256  ;;  %p3356_p11 = scmp.lt.s32.totalorder %s2729_s16, %s2729_s16 }
0x1087   : > { %p3350_p8 = scmp.ne.s32.totalorder %s2729_s16, %s3349_s19  ;;  %p3357_p12 = scmp.lt.s32.totalorder %s3349_s19, %s3349_s19 }
0x1089   : > { %p3358_p13 = por %p3357_p12, %p3356_p11 }
0x108a   : > { %s3894_s21 = sadd.s32 4294967295, %s3893_s30  }
0x108b   : > { %p3826_p7 = scmp.eq.s32.totalorder %s3894_s21, 1 }
0x108d   : > { %p3351_p9 = pnand %p3350_p8, %p3826_p7 }
0x108f   : > { %p3352_p10 = pneg %p3351_p9 }
0x1091   : > { %p3359_p0 = pnand %p3358_p13, %p3352_p10 }
0x1093   : > { %3362 = shalt.err (!%p3359_p0)
}
0x1094   : > { %s3896_s22 = sld [smem:[#allocation12_spill]] }
0x109a   : > { %s3363_s20 = scalar_lea.hbm %s3896_s22, 256 }
0x109b   : > { %p3364_p1 = scmp.ne.s32.totalorder %s3896_s22, %s3363_s20  ;;  %p3369_p4 = scmp.lt.u32.totalorder %s3363_s20, %s3896_s22 }
0x109d   : > { %p3365_p2 = pnand %p3364_p1, %p3826_p7 }
0x109f   : > { %p3366_p3 = pneg %p3365_p2 }
0x10a1   : > { %p3371_p5 = pnand %p3369_p4, %p3366_p3 }
0x10a3   : > { %3374 = shalt.err (!%p3371_p5)
}
0x10a4   : > { %s3417_s3 = smov 128   ;;  %s3418_s29 = smov 8  }
0x10a5   : > { %3260 = dma.vmem_to_hbm [thread:$0]  (%p3826_p7), %s2729_s16, 256, %s3896_s22, [#allocation4], %s3417_s3, %s3417_s3, %s3418_s29  }
0x10a6   : > { %3388 = dma.done.wait (%p3826_p7), [#allocation4], 256  }
0x10a7   : > { %3390 = vsyncadd (%p3826_p7), [#allocation4], 4294967040 }
0x10a8 PF: > { %s3897_s5 = sld [smem:[#allocation7_spill]]  ;;  %s3898_s25 = sld [smem:[#allocation6_spill]] }
0x10a9   : > { %s3899_s26 = sld [smem:[#allocation8_spill]] }
0x10ae   : > { %s24_s27 = sadd.s32 1, %s3897_s5  }
0x10af   : > { %p21_p6 = scmp.ge.s32.totalorder %s24_s27, 4  }
0x10b1   :  { %23 = sbr.rel (!%p21_p6) target bundleno = 6 (0x6), region = 147 }
0x10b8   :  { %2744 = vsyncpa [#allocation4], 1 }
0x10b9   :  { %2746 = vsyncpa [#allocation4 + $0x1], 1 }

</bundles_post_ra>
